<compile_context>
chip_gen: v6e
topology: v6e:2x2x1
jax: 0.10.0
libtpu: 0.0.40
codegen_flags: <defaults>
</compile_context>

<pallas_src>
import functools
import math

import jax
import jax.numpy as jnp
from jax import lax
from jax.experimental import pallas as pl
from jax.experimental.pallas import tpu as pltpu

NUM_STATES = 8     # small RL state vector
NUM_ACTIONS = 4
H1 = 50
H2 = 30

# Lane-packing factor: P samples share one packed row.  P=16 makes the fc1
# contraction P*NUM_STATES = 128 lanes (a full MXU K tile on v5e, half on v6e/v7x),
# keeps the block-diagonal weights ~1 MiB of bf16 (trivially VMEM resident on all
# generations), and keeps the block-diag FLOP inflation well below the unpacked
# kernel's MXU row-streaming cost (K=8 -> ~3% MXU utilization).
P = 16

K1 = P * NUM_STATES    # 128
N1 = P * H1            # 800
N2 = P * H2            # 480
N3 = P * NUM_ACTIONS   # 64

SUB_ROWS = 16          # packed rows per inner sub-tile (= 256 samples); multiples of 16
                       # keep slices aligned to the bf16 (16,128) sublane tile and live
                       # vregs at ~25/64 (no spills).
TBP_MAX = 128          # packed rows per grid step (= 2048 samples)
SMALL_BATCH = 1024     # below this, plain XLA beats any pallas_call fixed cost


def _cdiv(a, b):
    return -(-a // b)


def _round_up(n, m):
    return _cdiv(n, m) * m


def _mlp_kernel(xp_ref, w1_ref, b1_ref, w2_ref, b2_ref, w3_ref, b3_ref, o_ref,
                *, sub_rows):
    tbp = xp_ref.shape[0]
    n_sub = tbp // sub_rows

    # Weights are VMEM-resident (constant index_map).  Biases are broadcast once,
    # OUTSIDE the sub-tile loop (JAX does not CSE broadcast_in_dim).
    w1 = w1_ref[...]
    w2 = w2_ref[...]
    w3 = w3_ref[...]
    b1 = jnp.broadcast_to(b1_ref[...], (sub_rows, b1_ref.shape[1]))
    b2 = jnp.broadcast_to(b2_ref[...], (sub_rows, b2_ref.shape[1]))
    b3 = jnp.broadcast_to(b3_ref[...], (sub_rows, b3_ref.shape[1]))

    def body(s, carry):
        r0 = pl.multiple_of(s * sub_rows, sub_rows)
        rows = pl.ds(r0, sub_rows)

        x = xp_ref[rows, :]                                       # (sub, 128) bf16
        # fc1 + ReLU (bias add / ReLU stay f32 on the VPU; v5e VPU has no bf16)
        h1 = jnp.dot(x, w1, preferred_element_type=jnp.float32) + b1
        h1 = jnp.maximum(h1, 0.0)
        # fc2 + ReLU
        h2 = jnp.dot(h1.astype(jnp.bfloat16), w2,
                     preferred_element_type=jnp.float32) + b2
        h2 = jnp.maximum(h2, 0.0)
        # out (no activation, like the PyTorch module)
        out = jnp.dot(h2.astype(jnp.bfloat16), w3,
                      preferred_element_type=jnp.float32) + b3
        o_ref[rows, :] = out.astype(o_ref.dtype)
        return carry

    # Sub-tiling bounds live ranges (a whole-tile (TBP, 800) f32 intermediate would
    # blow through the 64-vreg file and spill); unroll gives the LLO scheduler
    # visibility across independent sub-tiles.
    lax.fori_loop(0, n_sub, body, 0, unroll=True)


def net_reference(x, params):
    """Plain-JAX forward with the same bf16-operand / f32-accumulate recipe."""
    h1 = jnp.maximum(
        jnp.dot(x.astype(jnp.bfloat16), params["w1"].astype(jnp.bfloat16),
                preferred_element_type=jnp.float32) + params["b1"], 0.0)
    h2 = jnp.maximum(
        jnp.dot(h1.astype(jnp.bfloat16), params["w2"].astype(jnp.bfloat16),
                preferred_element_type=jnp.float32) + params["b2"], 0.0)
    return jnp.dot(h2.astype(jnp.bfloat16), params["w3"].astype(jnp.bfloat16),
                   preferred_element_type=jnp.float32) + params["b3"]


@functools.partial(jax.jit, static_argnames=("impl", "tbp_max"))
def net_forward(x, params, *, impl="auto", tbp_max=TBP_MAX):
    """x: (B, NUM_STATES) float32.  Returns (B, NUM_ACTIONS) float32."""
    B = x.shape[0]
    if impl == "auto":
        impl = "pallas" if B >= SMALL_BATCH else "xla"
    if impl == "xla":
        # Actor-step sized batches: pallas_call fixed cost + padding dominate there.
        return net_reference(x, params)

    # ---- lane-packed Pallas path ----
    Bp = _cdiv(B, P)                       # packed rows of P samples each
    # Grid steps: cap the tile at tbp_max, keep >=2 steps whenever there is enough
    # work (v7x megacore shards the "parallel" batch axis across its 2 TensorCores),
    # and derive the tile from the step count so padding never ~doubles the work.
    steps = _cdiv(Bp, tbp_max)
    if Bp >= 2 * SUB_ROWS:
        steps = max(steps, 2)
    tbp = _round_up(_cdiv(Bp, steps), SUB_ROWS)
    steps = _cdiv(Bp, tbp)
    padded_Bp = steps * tbp

    # bf16 input transfer (the kernel truncates to bf16 before the MXU anyway) and a
    # zero-copy row-major reshape to packed rows: 128-lane-dense input DMA rows.
    xb = x.astype(jnp.bfloat16)
    pad = padded_Bp * P - B
    if pad:
        xb = jnp.pad(xb, ((0, pad), (0, 0)))
    xp = xb.reshape(padded_Bp, K1)

    w1p, b1p = params["w1p"], params["b1p"]
    w2p, b2p = params["w2p"], params["b2p"]
    w3p, b3p = params["w3p"], params["b3p"]

    # Weights/biases: constant block index -> single DMA, VMEM-resident across steps.
    const_spec = lambda a: pl.BlockSpec(a.shape, lambda i: (0, 0))

    flops = 2 * padded_Bp * (K1 * N1 + N1 * N2 + N2 * N3)
    bytes_accessed = (xp.size * 2 + padded_Bp * N3 * 4
                      + 2 * (w1p.size + w2p.size + w3p.size)
                      + 4 * (b1p.size + b2p.size + b3p.size))

    out = pl.pallas_call(
        functools.partial(_mlp_kernel, sub_rows=SUB_ROWS),
        out_shape=jax.ShapeDtypeStruct((padded_Bp, N3), jnp.float32),
        grid=(steps,),
        in_specs=[
            pl.BlockSpec((tbp, K1), lambda i: (i, 0)),
            const_spec(w1p), const_spec(b1p),
            const_spec(w2p), const_spec(b2p),
            const_spec(w3p), const_spec(b3p),
        ],
        out_specs=pl.BlockSpec((tbp, N3), lambda i: (i, 0)),
        compiler_params=pltpu.CompilerParams(
            dimension_semantics=("parallel",),
            # ~2.5 MiB actually used (double-buffered weights + tiles); explicit cap
            # keeps us well inside v7x's 64 MiB physical / 32 MiB default scoped VMEM.
            vmem_limit_bytes=32 * 1024 * 1024),
        cost_estimate=pl.CostEstimate(
            flops=flops, transcendentals=0, bytes_accessed=bytes_accessed),
    )(xp, w1p, b1p, w2p, b2p, w3p, b3p)

    # (padded_Bp, P*NUM_ACTIONS) -> (padded_Bp*P, NUM_ACTIONS): zero-copy unpack.
    return out.reshape(padded_Bp * P, NUM_ACTIONS)[:B]


def _block_diag(w, p):
    """(in, out) -> (p*in, p*out) block-diagonal with p copies of w."""
    return jnp.kron(jnp.eye(p, dtype=w.dtype), w)


def init_params(key):
    """Mirrors the PyTorch module: weights ~ Normal(0, 0.1) (stored transposed,
    (in_features, out_features)); biases ~ U(-1/sqrt(fan_in), 1/sqrt(fan_in))
    (PyTorch Linear default).  Also precomputes, once, the P-way block-diagonal
    bf16 weights and tiled biases used by the lane-packed Pallas kernel."""
    ks = jax.random.split(key, 6)

    def linear(kw, kb, fan_in, fan_out):
        w = 0.1 * jax.random.normal(kw, (fan_in, fan_out), dtype=jnp.float32)
        bound = 1.0 / math.sqrt(fan_in)
        b = jax.random.uniform(kb, (1, fan_out), jnp.float32, -bound, bound)
        return w, b

    params = {}
    layer_defs = [(ks[0], ks[1], NUM_STATES, H1),
                  (ks[2], ks[3], H1, H2),
                  (ks[4], ks[5], H2, NUM_ACTIONS)]
    for i, (kw, kb, fi, fo) in enumerate(layer_defs, start=1):
        w, b = linear(kw, kb, fi, fo)
        params[f"w{i}"] = w                                        # f32, for reference/fallback
        params[f"b{i}"] = b
        params[f"w{i}p"] = _block_diag(w, P).astype(jnp.bfloat16)  # packed kernel weights
        params[f"b{i}p"] = jnp.tile(b, (1, P))                     # packed f32 biases
    return params


if __name__ == "__main__":
    key = jax.random.PRNGKey(0)
    k_params, k_small, k_big = jax.random.split(key, 3)
    params = init_params(k_params)

    # Small batch (RL actor step) forced through the Pallas kernel once (exercises the
    # padded single-step grid).  The auto path would use plain XLA at this size.
    x_small = jax.random.normal(k_small, (2, NUM_STATES), dtype=jnp.float32)
    out_small = jax.block_until_ready(net_forward(x_small, params, impl="pallas"))
    ref_small = net_reference(x_small, params)
    assert out_small.shape == (2, NUM_ACTIONS)
    assert jnp.allclose(out_small, ref_small, atol=1e-3, rtol=1e-3)

    # Replay-buffer batch: auto path -> Pallas, 2 "parallel" grid steps of 128 packed rows.
    x_big = jax.random.normal(k_big, (4096, NUM_STATES), dtype=jnp.float32)
    out_big = jax.block_until_ready(net_forward(x_big, params))
    ref_big = net_reference(x_big, params)
    assert out_big.shape == (4096, NUM_ACTIONS)
    assert jnp.allclose(out_big, ref_big, atol=1e-3, rtol=1e-3)

    # Mid/small batch: auto path -> plain-XLA fallback.
    x_mid = jax.random.normal(k_small, (64, NUM_STATES), dtype=jnp.float32)
    out_mid = jax.block_until_ready(net_forward(x_mid, params))
    assert out_mid.shape == (64, NUM_ACTIONS)
    assert jnp.allclose(out_mid, net_reference(x_mid, params), atol=1e-3, rtol=1e-3)

    print("KERNEL_OK")
</pallas_src>

<mosaic_0001>
module attributes {stable_mosaic.version = 11 : i64} {
  func.func @_mlp_kernel(%arg0: i32, %arg1: memref<16x128xbf16, #tpu.memory_space<vmem>>, %arg2: memref<128x800xbf16, #tpu.memory_space<vmem>>, %arg3: memref<1x800xf32, #tpu.memory_space<vmem>>, %arg4: memref<800x480xbf16, #tpu.memory_space<vmem>>, %arg5: memref<1x480xf32, #tpu.memory_space<vmem>>, %arg6: memref<480x64xbf16, #tpu.memory_space<vmem>>, %arg7: memref<1x64xf32, #tpu.memory_space<vmem>>, %arg8: memref<16x64xf32, #tpu.memory_space<vmem>>) attributes {dimension_semantics = [#tpu.dimension_semantics<parallel>], iteration_bounds = array<i64: 1>, scalar_prefetch = 0 : i64, scratch_operands = 0 : i64, tpu.core_type = #tpu.core_type<tc>, window_params = [{transform_indices = @transform_0, window_bounds = array<i64: 16, 128>}, {pipeline_mode = #tpu.pipeline_mode<synchronous>, transform_indices = @transform_1, window_bounds = array<i64: 128, 800>}, {pipeline_mode = #tpu.pipeline_mode<synchronous>, transform_indices = @transform_2, window_bounds = array<i64: 1, 800>}, {pipeline_mode = #tpu.pipeline_mode<synchronous>, transform_indices = @transform_3, window_bounds = array<i64: 800, 480>}, {pipeline_mode = #tpu.pipeline_mode<synchronous>, transform_indices = @transform_4, window_bounds = array<i64: 1, 480>}, {pipeline_mode = #tpu.pipeline_mode<synchronous>, transform_indices = @transform_5, window_bounds = array<i64: 480, 64>}, {pipeline_mode = #tpu.pipeline_mode<synchronous>, transform_indices = @transform_6, window_bounds = array<i64: 1, 64>}, {transform_indices = @transform_7, window_bounds = array<i64: 16, 64>}]} {
    %c0 = arith.constant 0 : index
    %c0_0 = arith.constant 0 : index
    %0 = vector.load %arg2[%c0, %c0_0] : memref<128x800xbf16, #tpu.memory_space<vmem>>, vector<128x800xbf16>
    %c0_1 = arith.constant 0 : index
    %c0_2 = arith.constant 0 : index
    %1 = vector.load %arg4[%c0_1, %c0_2] : memref<800x480xbf16, #tpu.memory_space<vmem>>, vector<800x480xbf16>
    %c0_3 = arith.constant 0 : index
    %c0_4 = arith.constant 0 : index
    %2 = vector.load %arg6[%c0_3, %c0_4] : memref<480x64xbf16, #tpu.memory_space<vmem>>, vector<480x64xbf16>
    %c0_5 = arith.constant 0 : index
    %c0_6 = arith.constant 0 : index
    %3 = vector.load %arg3[%c0_5, %c0_6] : memref<1x800xf32, #tpu.memory_space<vmem>>, vector<1x800xf32>
    %4 = vector.shape_cast %3 : vector<1x800xf32> to vector<1x800xf32>
    %5 = vector.broadcast %4 : vector<1x800xf32> to vector<16x800xf32>
    %c0_7 = arith.constant 0 : index
    %c0_8 = arith.constant 0 : index
    %6 = vector.load %arg5[%c0_7, %c0_8] : memref<1x480xf32, #tpu.memory_space<vmem>>, vector<1x480xf32>
    %7 = vector.shape_cast %6 : vector<1x480xf32> to vector<1x480xf32>
    %8 = vector.broadcast %7 : vector<1x480xf32> to vector<16x480xf32>
    %c0_9 = arith.constant 0 : index
    %c0_10 = arith.constant 0 : index
    %9 = vector.load %arg7[%c0_9, %c0_10] : memref<1x64xf32, #tpu.memory_space<vmem>>, vector<1x64xf32>
    %10 = vector.shape_cast %9 : vector<1x64xf32> to vector<1x64xf32>
    %11 = vector.broadcast %10 : vector<1x64xf32> to vector<16x64xf32>
    %c0_i32 = arith.constant 0 : i32
    %c16_i32 = arith.constant 16 : i32
    %12 = arith.muli %c0_i32, %c16_i32 : i32
    %13 = tpu.assume_multiple %12, 16 : i32
    %14 = arith.index_cast %13 : i32 to index
    %c0_11 = arith.constant 0 : index
    %15 = vector.load %arg1[%14, %c0_11] : memref<16x128xbf16, #tpu.memory_space<vmem>>, vector<16x128xbf16>
    %cst = arith.constant dense<0.000000e+00> : vector<16x800xf32>
    %16 = tpu.matmul %15, %0, %cst {dimension_numbers = #tpu.dot_dimension_numbers<[1], [0], [0], [1], [0, 0, 1, 1], [], []>} : vector<16x128xbf16>, vector<128x800xbf16>, vector<16x800xf32> -> vector<16x800xf32>
    %17 = arith.addf %16, %5 : vector<16x800xf32>
    %cst_12 = arith.constant 0.000000e+00 : f32
    %18 = vector.broadcast %cst_12 : f32 to vector<16x800xf32>
    %19 = arith.maximumf %17, %18 : vector<16x800xf32>
    %20 = arith.truncf %19 : vector<16x800xf32> to vector<16x800xbf16>
    %cst_13 = arith.constant dense<0.000000e+00> : vector<16x480xf32>
    %21 = tpu.matmul %20, %1, %cst_13 {dimension_numbers = #tpu.dot_dimension_numbers<[1], [0], [0], [1], [0, 0, 1, 1], [], []>} : vector<16x800xbf16>, vector<800x480xbf16>, vector<16x480xf32> -> vector<16x480xf32>
    %22 = arith.addf %21, %8 : vector<16x480xf32>
    %cst_14 = arith.constant 0.000000e+00 : f32
    %23 = vector.broadcast %cst_14 : f32 to vector<16x480xf32>
    %24 = arith.maximumf %22, %23 : vector<16x480xf32>
    %25 = arith.truncf %24 : vector<16x480xf32> to vector<16x480xbf16>
    %cst_15 = arith.constant dense<0.000000e+00> : vector<16x64xf32>
    %26 = tpu.matmul %25, %2, %cst_15 {dimension_numbers = #tpu.dot_dimension_numbers<[1], [0], [0], [1], [0, 0, 1, 1], [], []>} : vector<16x480xbf16>, vector<480x64xbf16>, vector<16x64xf32> -> vector<16x64xf32>
    %27 = arith.addf %26, %11 : vector<16x64xf32>
    %28 = arith.index_cast %13 : i32 to index
    %c0_16 = arith.constant 0 : index
    %29 = vector.load %arg8[%28, %c0_16] : memref<16x64xf32, #tpu.memory_space<vmem>>, vector<16x64xf32>
    tpu.vector_store %arg8[%28, %c0_16], %27 {strides = array<i32>} : memref<16x64xf32, #tpu.memory_space<vmem>>, vector<16x64xf32>,
    %c1_i32 = arith.constant 1 : i32
    return
  }
  func.func @transform_0(%arg0: i32) -> (i32, i32) {
    %c0_i32 = arith.constant 0 : i32
    %c0_i32_0 = arith.constant 0 : i32
    return %arg0, %c0_i32 : i32, i32
  }
  func.func @transform_1(%arg0: i32) -> (i32, i32) {
    %c0_i32 = arith.constant 0 : i32
    %c0_i32_0 = arith.constant 0 : i32
    %c0_i32_1 = arith.constant 0 : i32
    return %c0_i32, %c0_i32_0 : i32, i32
  }
  func.func @transform_2(%arg0: i32) -> (i32, i32) {
    %c0_i32 = arith.constant 0 : i32
    %c0_i32_0 = arith.constant 0 : i32
    %c0_i32_1 = arith.constant 0 : i32
    return %c0_i32, %c0_i32_0 : i32, i32
  }
  func.func @transform_3(%arg0: i32) -> (i32, i32) {
    %c0_i32 = arith.constant 0 : i32
    %c0_i32_0 = arith.constant 0 : i32
    %c0_i32_1 = arith.constant 0 : i32
    return %c0_i32, %c0_i32_0 : i32, i32
  }
  func.func @transform_4(%arg0: i32) -> (i32, i32) {
    %c0_i32 = arith.constant 0 : i32
    %c0_i32_0 = arith.constant 0 : i32
    %c0_i32_1 = arith.constant 0 : i32
    return %c0_i32, %c0_i32_0 : i32, i32
  }
  func.func @transform_5(%arg0: i32) -> (i32, i32) {
    %c0_i32 = arith.constant 0 : i32
    %c0_i32_0 = arith.constant 0 : i32
    %c0_i32_1 = arith.constant 0 : i32
    return %c0_i32, %c0_i32_0 : i32, i32
  }
  func.func @transform_6(%arg0: i32) -> (i32, i32) {
    %c0_i32 = arith.constant 0 : i32
    %c0_i32_0 = arith.constant 0 : i32
    %c0_i32_1 = arith.constant 0 : i32
    return %c0_i32, %c0_i32_0 : i32, i32
  }
  func.func @transform_7(%arg0: i32) -> (i32, i32) {
    %c0_i32 = arith.constant 0 : i32
    %c0_i32_0 = arith.constant 0 : i32
    return %arg0, %c0_i32 : i32, i32
  }
}

</mosaic_0001>

<bundles_post_ra>
// kernel: net_forward.1
= control target key start
LH: loop header
LB: loop body
LE: loop exit
PB: predicated region body
PF: predicated region fallthrough
CT: control target
= control target key end

     0   :  { %12 = vsyncpa [#allocation3], 0  ;;  %s3333_s24 = smov [#allocation2]   ;;  %s3755_s0 = inlined_call_operand.vmem [shape: bf16[16,128], index: 0, kind: input, shape index: {}]   ;;  %s3756_s1 = inlined_call_operand.vmem [shape: bf16[128,800], index: 1, kind: input, shape index: {}]   ;;  %s3757_s2 = inlined_call_operand.vmem [shape: f32[1,800], index: 2, kind: input, shape index: {}]   ;;  %s3758_s3 = inlined_call_operand.hbm [shape: bf16[800,480], index: 3, kind: input, shape index: {}]   ;;  %s3759_s4 = inlined_call_operand.vmem [shape: f32[1,480], index: 4, kind: input, shape index: {}]   ;;  %s3760_s5 = inlined_call_operand.vmem [shape: bf16[480,64], index: 5, kind: input, shape index: {}]   ;;  %s3761_s6 = inlined_call_operand.vmem [shape: f32[1,64], index: 6, kind: input, shape index: {}]   ;;  %s3762_s7 = inlined_call_operand.vmem [shape: f32[16,64], index: 7, kind: output, shape index: {}]  }
   0x1   :  { %s24_s25 = sshll.u32 %s3333_s24, 4  ;;  %s25_s25 = int_to_ptr.vmem [resolvable:$true] %s24_s25 }
   0x2   :  { %s3319_s26 = scalar_lea.vmem %s25_s25, 25600  ;;  %p3324_p1 = scmp.lt.s32.totalorder %s25_s25, %s25_s25 }
   0x3   :  { %p3320_p0 = scmp.ne.s32.totalorder %s25_s25, %s3319_s26  ;;  %p3325_p2 = scmp.lt.s32.totalorder %s3319_s26, %s3319_s26 }
   0x5   :  { %p3326_p3 = por %p3325_p2, %p3324_p1 }
   0x7   :  { %p3327_p4 = pnand %p3326_p3, %p3320_p0 }
   0x9   :  { %3330 = shalt.err (!%p3327_p4)
}
   0xa   :  { %s3334_s27 = smov 256   ;;  %s3335_s28 = smov 16  }
   0xb   :  { %30 = dma.hbm_to_vmem [thread:$0]  %s3758_s3, 25600, %s25_s25, [#allocation3], %s3334_s27, %s3334_s27, %s3335_s28  }
   0xc   :  { %3331 = dma.done.wait [#allocation3], 25600  }
   0xd   :  { %3332 = vsyncadd [#allocation3], 4294941696  ;;  %v3336_v0 = vmov 0   ;;  %v2900_v1 = vld [vmem:[%s3756_s1 + $0x18c] ss:$28 sps:$4 sm:$0xff]   ;;  %v3486_v34 = vld [vmem:[%s3755_s0] sm:$0xff]  }
   0xe   :  { %759 = vmatprep.mubr.bf16.mxu0 %v3336_v0  ;;  %802 = vmatprep.mubr.bf16.mxu1 %v3336_v0  ;;  %v2902_v2 = vld [vmem:[%s3756_s1 + $0x194] ss:$28 sps:$4 sm:$0xff]   ;;  %v2904_v3 = vld [vmem:[%s3756_s1 + $0x188] ss:$28 sps:$4 sm:$0xff]   ;;  %v2908_v6 = vld [vmem:[%s3756_s1 + $0x15c] ss:$28 sps:$4 sm:$0xff]  }
   0xf   :  { %727 = vmatprep.subr.bf16.mxu0 %v2900_v1  ;;  %v2905_v4 = vld [vmem:[%s3756_s1 + $0x190] ss:$28 sps:$4 sm:$0xff]   ;;  %770 = vmatprep.subr.bf16.mxu1 %v2902_v2  ;;  %v2911_v8 = vld [vmem:[%s3756_s1 + $0x158] ss:$28 sps:$4 sm:$0xff]   ;;  %v2914_v10 = vld [vmem:[%s3756_s1 + $0x124] ss:$28 sps:$4 sm:$0xff]  }
  0x10   :  { %v2906_v5 = vld [vmem:[%s3756_s1 + $0x154] ss:$28 sps:$4 sm:$0xff]   ;;  %728 = vmatpush1.bf16.msra.mxu0 %v2904_v3  ;;  %771 = vmatpush1.bf16.msra.mxu1 %v2905_v4  ;;  %v2912_v9 = vld [vmem:[%s3756_s1 + $0x11c] ss:$28 sps:$4 sm:$0xff]   ;;  %v2918_v13 = vld [vmem:[%s3756_s1 + $0xe4] ss:$28 sps:$4 sm:$0xff]  }
  0x11   :  { %v2910_v7 = vld [vmem:[%s3756_s1 + $0x150] ss:$28 sps:$4 sm:$0xff]   ;;  %729 = vmatprep.subr.bf16.mxu0 %v2906_v5  ;;  %772 = vmatprep.subr.bf16.mxu1 %v2908_v6  ;;  %v2916_v11 = vld [vmem:[%s3756_s1 + $0x118] ss:$28 sps:$4 sm:$0xff]   ;;  %v2917_v12 = vld [vmem:[%s3756_s1 + $0x120] ss:$28 sps:$4 sm:$0xff]  }
  0x12   :  { %v2920_v14 = vld [vmem:[%s3756_s1 + $0xec] ss:$28 sps:$4 sm:$0xff]   ;;  %v2922_v15 = vld [vmem:[%s3756_s1 + $0xe0] ss:$28 sps:$4 sm:$0xff]   ;;  %v2926_v18 = vld [vmem:[%s3756_s1 + $0xb4] ss:$28 sps:$4 sm:$0xff]  }
  0x13   :  { %v2923_v16 = vld [vmem:[%s3756_s1 + $0xe8] ss:$28 sps:$4 sm:$0xff]   ;;  %v2929_v20 = vld [vmem:[%s3756_s1 + $0xb0] ss:$28 sps:$4 sm:$0xff]   ;;  %v2932_v22 = vld [vmem:[%s3756_s1 + $0x7c] ss:$28 sps:$4 sm:$0xff]  }
  0x14   :  { %730 = vmatpush1.bf16.msra.mxu0 %v2910_v7  ;;  %773 = vmatpush1.bf16.msra.mxu1 %v2911_v8  ;;  %v2924_v17 = vld [vmem:[%s3756_s1 + $0xac] ss:$28 sps:$4 sm:$0xff]   ;;  %v2930_v21 = vld [vmem:[%s3756_s1 + $0x74] ss:$28 sps:$4 sm:$0xff]   ;;  %v2936_v25 = vld [vmem:[%s3756_s1 + $0x3c] ss:$28 sps:$4 sm:$0xff]  }
  0x15   :  { %731 = vmatprep.subr.bf16.mxu0 %v2912_v9  ;;  %774 = vmatprep.subr.bf16.mxu1 %v2914_v10  ;;  %v2928_v19 = vld [vmem:[%s3756_s1 + $0xa8] ss:$28 sps:$4 sm:$0xff]   ;;  %v2934_v23 = vld [vmem:[%s3756_s1 + $0x70] ss:$28 sps:$4 sm:$0xff]   ;;  %v2935_v24 = vld [vmem:[%s3756_s1 + $0x78] ss:$28 sps:$4 sm:$0xff]  }
  0x16   :  { %v2938_v26 = vld [vmem:[%s3756_s1 + $0x44] ss:$28 sps:$4 sm:$0xff]   ;;  %v2940_v27 = vld [vmem:[%s3756_s1 + $0x38] ss:$28 sps:$4 sm:$0xff]   ;;  %v2944_v30 = vld [vmem:[%s3756_s1 + $0xc] ss:$28 sps:$4 sm:$0xff]  }
  0x17   :  { %v2941_v28 = vld [vmem:[%s3756_s1 + $0x40] ss:$28 sps:$4 sm:$0xff]   ;;  %v2947_v32 = vld [vmem:[%s3756_s1 + $0x8] ss:$28 sps:$4 sm:$0xff]   ;;  %v2949_v35 = vld [vmem:[%s3756_s1 + $0x198] ss:$28 sps:$4 sm:$0xff]  }
  0x18   :  { %732 = vmatpush1.bf16.msra.mxu0 %v2916_v11  ;;  %775 = vmatpush1.bf16.msra.mxu1 %v2917_v12  ;;  %v2942_v29 = vld [vmem:[%s3756_s1 + $0x4] ss:$28 sps:$4 sm:$0xff]   ;;  %v2951_v33 = vld [vmem:[%s3756_s1 + $0x19c] ss:$28 sps:$4 sm:$0xff]   ;;  %v3337_v38 = vmov 0.0   ;;  %vm3338_vm0 = vmmov 0  }
  0x19   :  { %733 = vmatprep.subr.bf16.mxu0 %v2918_v13  ;;  %776 = vmatprep.subr.bf16.mxu1 %v2920_v14  ;;  %v2946_v31 = vld [vmem:[%s3756_s1] ss:$28 sps:$4 sm:$0xff]   ;;  %v2965_v40 = vld [vmem:[%s3756_s1 + $0x168] ss:$28 sps:$4 sm:$0xff]   ;;  %v2969_v43 = vld [vmem:[%s3756_s1 + $0x130] ss:$28 sps:$4 sm:$0xff]  }
  0x1a   :  { %v2961_v36 = vld [vmem:[%s3756_s1 + $0x1a0] ss:$28 sps:$4 sm:$0xff]   ;;  %v2957_v41 = vld [vmem:[%s3756_s1 + $0x12c] ss:$28 sps:$4 sm:$0xff]   ;;  %v2960_v44 = vld [vmem:[%s3756_s1 + $0xf4] ss:$28 sps:$4 sm:$0xff]  }
  0x1b   :  { %v2954_v37 = vld [vmem:[%s3756_s1 + $0x164] ss:$28 sps:$4 sm:$0xff]   ;;  %v2958_v45 = vld [vmem:[%s3756_s1 + $0xf0] ss:$28 sps:$4 sm:$0xff]   ;;  %v2973_v46 = vld [vmem:[%s3756_s1 + $0xf8] ss:$28 sps:$4 sm:$0xff]  }
  0x1c   :  { %734 = vmatpush1.bf16.msra.mxu0 %v2922_v15  ;;  %777 = vmatpush1.bf16.msra.mxu1 %v2923_v16  ;;  %v2952_v39 = vld [vmem:[%s3756_s1 + $0x160] ss:$28 sps:$4 sm:$0xff]   ;;  %v2955_v42 = vld [vmem:[%s3756_s1 + $0x128] ss:$28 sps:$4 sm:$0xff]   ;;  %v2962_v48 = vld [vmem:[%s3756_s1 + $0xb8] ss:$28 sps:$4 sm:$0xff]  }
  0x1d   :  { %735 = vmatprep.subr.bf16.mxu0 %v2924_v17  ;;  %778 = vmatprep.subr.bf16.mxu1 %v2926_v18  ;;  %v2964_v47 = vld [vmem:[%s3756_s1 + $0xbc] ss:$28 sps:$4 sm:$0xff]   ;;  %v2968_v50 = vld [vmem:[%s3756_s1 + $0x84] ss:$28 sps:$4 sm:$0xff]   ;;  %v2972_v53 = vld [vmem:[%s3756_s1 + $0x4c] ss:$28 sps:$4 sm:$0xff]  }
  0x1e   :  { %v2977_v49 = vld [vmem:[%s3756_s1 + $0xc0] ss:$28 sps:$4 sm:$0xff]   ;;  %v2978_v52 = vld [vmem:[%s3756_s1 + $0x88] ss:$28 sps:$4 sm:$0xff]   ;;  %v2979_v55 = vld [vmem:[%s3756_s1 + $0x50] ss:$28 sps:$4 sm:$0xff]  }
  0x1f   :  { %v2966_v51 = vld [vmem:[%s3756_s1 + $0x80] ss:$28 sps:$4 sm:$0xff]   ;;  %v2970_v54 = vld [vmem:[%s3756_s1 + $0x48] ss:$28 sps:$4 sm:$0xff]   ;;  %v2976_v56 = vld [vmem:[%s3756_s1 + $0x14] ss:$28 sps:$4 sm:$0xff]  }
  0x20   :  { %736 = vmatpush1.bf16.msra.mxu0 %v2928_v19  ;;  %779 = vmatpush1.bf16.msra.mxu1 %v2929_v20  ;;  %v2974_v57 = vld [vmem:[%s3756_s1 + $0x10] ss:$28 sps:$4 sm:$0xff]   ;;  %v2980_v58 = vld [vmem:[%s3756_s1 + $0x18] ss:$28 sps:$4 sm:$0xff]   ;;  %vm1918_vm1 = vcmask 261120   ;;  %vm2458_vm2 = vcmask 785408  }
  0x21   :  { %737 = vmatprep.subr.bf16.mxu0 %v2930_v21  ;;  %780 = vmatprep.subr.bf16.mxu1 %v2932_v22  ;;  %v2983_v59 = vld [vmem:[#allocation2 + $0xe4] ss:$16 sps:$4 sm:$0xff]   ;;  %v2981_v61 = vld [vmem:[#allocation2 + $0xe0] ss:$16 sps:$4 sm:$0xff]   ;;  %vm2544_vm3 = vcmask 523264  }
  0x22   :  { %v2986_v60 = vld [vmem:[#allocation2 + $0x2e4] ss:$16 sps:$4 sm:$0xff]   ;;  %v2984_v62 = vld [vmem:[#allocation2 + $0x2e0] ss:$16 sps:$4 sm:$0xff]  }
  0x23   :  { %v2989_v63 = vld [vmem:[#allocation2 + $0xc4] ss:$16 sps:$4 sm:$0xff]   ;;  %v2987_v2 = vld [vmem:[#allocation2 + $0xc0] ss:$16 sps:$4 sm:$0xff]  }
  0x24   :  { %738 = vmatpush1.bf16.msra.mxu0 %v2934_v23  ;;  %781 = vmatpush1.bf16.msra.mxu1 %v2935_v24  ;;  %v2992_v1 = vld [vmem:[#allocation2 + $0x2c4] ss:$16 sps:$4 sm:$0xff]   ;;  %v2990_v3 = vld [vmem:[#allocation2 + $0x2c0] ss:$16 sps:$4 sm:$0xff]  }
  0x25   :  { %739 = vmatprep.subr.bf16.mxu0 %v2936_v25  ;;  %782 = vmatprep.subr.bf16.mxu1 %v2938_v26  ;;  %v2995_v4 = vld [vmem:[#allocation2 + $0xa4] ss:$16 sps:$4 sm:$0xff]   ;;  %v2993_v6 = vld [vmem:[#allocation2 + $0xa0] ss:$16 sps:$4 sm:$0xff]  }
  0x26   :  { %v2998_v5 = vld [vmem:[#allocation2 + $0x2a4] ss:$16 sps:$4 sm:$0xff]   ;;  %v2996_v7 = vld [vmem:[#allocation2 + $0x2a0] ss:$16 sps:$4 sm:$0xff]  }
  0x27   :  { %v3001_v8 = vld [vmem:[#allocation2 + $0x84] ss:$16 sps:$4 sm:$0xff]   ;;  %v2999_v10 = vld [vmem:[#allocation2 + $0x80] ss:$16 sps:$4 sm:$0xff]  }
  0x28   :  { %740 = vmatpush1.bf16.msra.mxu0 %v2940_v27  ;;  %783 = vmatpush1.bf16.msra.mxu1 %v2941_v28  ;;  %v3004_v9 = vld [vmem:[#allocation2 + $0x284] ss:$16 sps:$4 sm:$0xff]   ;;  %v3002_v11 = vld [vmem:[#allocation2 + $0x280] ss:$16 sps:$4 sm:$0xff]  }
  0x29   :  { %741 = vmatprep.subr.bf16.mxu0 %v2942_v29  ;;  %784 = vmatprep.subr.bf16.mxu1 %v2944_v30  ;;  %v3007_v12 = vld [vmem:[#allocation2 + $0x64] ss:$16 sps:$4 sm:$0xff]   ;;  %v3005_v14 = vld [vmem:[#allocation2 + $0x60] ss:$16 sps:$4 sm:$0xff]  }
  0x2a   :  { %v3010_v13 = vld [vmem:[#allocation2 + $0x264] ss:$16 sps:$4 sm:$0xff]   ;;  %v3008_v15 = vld [vmem:[#allocation2 + $0x260] ss:$16 sps:$4 sm:$0xff]  }
  0x2b   :  { %v3013_v16 = vld [vmem:[#allocation2 + $0x44] ss:$16 sps:$4 sm:$0xff]   ;;  %v3011_v18 = vld [vmem:[#allocation2 + $0x40] ss:$16 sps:$4 sm:$0xff]  }
  0x2c   :  { %742 = vmatpush1.bf16.msra.mxu0 %v2946_v31  ;;  %785 = vmatpush1.bf16.msra.mxu1 %v2947_v32  ;;  %v3016_v17 = vld [vmem:[#allocation2 + $0x244] ss:$16 sps:$4 sm:$0xff]   ;;  %v3014_v19 = vld [vmem:[#allocation2 + $0x240] ss:$16 sps:$4 sm:$0xff]  }
  0x2d   :  { %813 = vmatprep.subr.bf16.mxu0 %v2951_v33  ;;  %2874 = vmatprep.subr.bf16.mxu1 %v3337_v38  ;;  %v3019_v20 = vld [vmem:[#allocation2 + $0x24] ss:$16 sps:$4 sm:$0xff]   ;;  %v3017_v22 = vld [vmem:[#allocation2 + $0x20] ss:$16 sps:$4 sm:$0xff]  }
  0x2e   :  { %v3022_v21 = vld [vmem:[#allocation2 + $0x224] ss:$16 sps:$4 sm:$0xff]   ;;  %v3020_v23 = vld [vmem:[#allocation2 + $0x220] ss:$16 sps:$4 sm:$0xff]  }
  0x2f   :  { %760 = vmatmul.mubr.bf16.vlgmr.msra.gmra.mxu0 %v3486_v34  ;;  %803 = vmatmul.mubr.bf16.vlgmr.msra.gmra.mxu1 %v3486_v34  ;;  %v3025_v24 = vld [vmem:[#allocation2 + $0x4] ss:$16 sps:$4 sm:$0xff]   ;;  %v3023_v26 = vld [vmem:[#allocation2] ss:$16 sps:$4 sm:$0xff]  }
  0x30   :  { %814 = vmatpush1.bf16.msra.mxu0 %v2949_v35  ;;  %2875 = vmatpush3.bf16.msra.mxu1 %v2961_v36  ;;  %v3028_v25 = vld [vmem:[#allocation2 + $0x204] ss:$16 sps:$4 sm:$0xff]   ;;  %v3026_v27 = vld [vmem:[#allocation2 + $0x200] ss:$16 sps:$4 sm:$0xff]  }
  0x31   :  { %815 = vmatprep.subr.bf16.mxu0 %v2954_v37  ;;  %2876 = vmatprep.subr.bf16.mxu1 %v3337_v38  ;;  %v3031_v28 = vld [vmem:[#allocation2 + $0x1e4] ss:$16 sps:$4 sm:$0xff]   ;;  %v3029_v30 = vld [vmem:[#allocation2 + $0x1e0] ss:$16 sps:$4 sm:$0xff]  }
  0x32   :  { %845 = vmatprep.mubr.bf16.mxu0 %v3336_v0  ;;  %2890 = vmatprep.mubr.msk.bf16.mxu1 %vm3338_vm0, %v3337_v38  ;;  %v3034_v29 = vld [vmem:[#allocation2 + $0x3e4] ss:$16 sps:$4 sm:$0xff]   ;;  %v3032_v31 = vld [vmem:[#allocation2 + $0x3e0] ss:$16 sps:$4 sm:$0xff]  }
  0x33   :  { %v3037_v32 = vld [vmem:[#allocation2 + $0x1c4] ss:$16 sps:$4 sm:$0xff]   ;;  %v3038_v35 = vld [vmem:[#allocation2 + $0x3c0] ss:$16 sps:$4 sm:$0xff]  }
  0x34   :  { %816 = vmatpush1.bf16.msra.mxu0 %v2952_v39  ;;  %2877 = vmatpush3.bf16.msra.mxu1 %v2965_v40  ;;  %v3040_v33 = vld [vmem:[#allocation2 + $0x3c4] ss:$16 sps:$4 sm:$0xff]   ;;  %v3044_v39 = vld [vmem:[#allocation2 + $0x3a0] ss:$16 sps:$4 sm:$0xff]  }
  0x35   :  { %817 = vmatprep.subr.bf16.mxu0 %v2957_v41  ;;  %2878 = vmatprep.subr.bf16.mxu1 %v3337_v38  ;;  %v3043_v36 = vld [vmem:[#allocation2 + $0x1a4] ss:$16 sps:$4 sm:$0xff]  }
  0x36   :  { %v3046_v37 = vld [vmem:[#allocation2 + $0x3a4] ss:$16 sps:$4 sm:$0xff]  }
  0x37   :  { %v3049_v40 = vld [vmem:[#allocation2 + $0x184] ss:$16 sps:$4 sm:$0xff]  }
  0x38   :  { %818 = vmatpush1.bf16.msra.mxu0 %v2955_v42  ;;  %2879 = vmatpush3.bf16.msra.mxu1 %v2969_v43  ;;  %v3052_v41 = vld [vmem:[#allocation2 + $0x384] ss:$16 sps:$4 sm:$0xff]   ;;  %v3047_v42 = vld [vmem:[#allocation2 + $0x180] ss:$16 sps:$4 sm:$0xff]  }
  0x39   :  { %819 = vmatprep.subr.bf16.mxu0 %v2960_v44  ;;  %2880 = vmatprep.subr.bf16.mxu1 %v3337_v38  ;;  %v3050_v43 = vld [vmem:[#allocation2 + $0x380] ss:$16 sps:$4 sm:$0xff]   ;;  %v3055_v44 = vld [vmem:[#allocation2 + $0x164] ss:$16 sps:$4 sm:$0xff]  }
  0x3c   :  { %820 = vmatpush1.bf16.msra.mxu0 %v2958_v45  ;;  %2881 = vmatpush3.bf16.msra.mxu1 %v2973_v46  ;;  %v3058_v45 = vld [vmem:[#allocation2 + $0x364] ss:$16 sps:$4 sm:$0xff]   ;;  %v3053_v46 = vld [vmem:[#allocation2 + $0x160] ss:$16 sps:$4 sm:$0xff]  }
  0x3d   :  { %821 = vmatprep.subr.bf16.mxu0 %v2964_v47  ;;  %2882 = vmatprep.subr.bf16.mxu1 %v3337_v38  ;;  %v3056_v47 = vld [vmem:[#allocation2 + $0x360] ss:$16 sps:$4 sm:$0xff]  }
  0x40   :  { %822 = vmatpush1.bf16.msra.mxu0 %v2962_v48  ;;  %2883 = vmatpush3.bf16.msra.mxu1 %v2977_v49  ;;  %v3061_v48 = vld [vmem:[#allocation2 + $0x144] ss:$16 sps:$4 sm:$0xff]  }
  0x41   :  { %823 = vmatprep.subr.bf16.mxu0 %v2968_v50  ;;  %2884 = vmatprep.subr.bf16.mxu1 %v3337_v38  ;;  %v3064_v49 = vld [vmem:[#allocation2 + $0x344] ss:$16 sps:$4 sm:$0xff]   ;;  %v3059_v50 = vld [vmem:[#allocation2 + $0x140] ss:$16 sps:$4 sm:$0xff]  }
  0x44   :  { %824 = vmatpush1.bf16.msra.mxu0 %v2966_v51  ;;  %2885 = vmatpush3.bf16.msra.mxu1 %v2978_v52  ;;  %v3062_v51 = vld [vmem:[#allocation2 + $0x340] ss:$16 sps:$4 sm:$0xff]   ;;  %v3067_v52 = vld [vmem:[#allocation2 + $0x124] ss:$16 sps:$4 sm:$0xff]  }
  0x45   :  { %825 = vmatprep.subr.bf16.mxu0 %v2972_v53  ;;  %2886 = vmatprep.subr.bf16.mxu1 %v3337_v38  ;;  %v3070_v53 = vld [vmem:[#allocation2 + $0x324] ss:$16 sps:$4 sm:$0xff]  }
  0x48   :  { %826 = vmatpush1.bf16.msra.mxu0 %v2970_v54  ;;  %2887 = vmatpush3.bf16.msra.mxu1 %v2979_v55  ;;  %v3065_v54 = vld [vmem:[#allocation2 + $0x120] ss:$16 sps:$4 sm:$0xff]  }
  0x49   :  { %827 = vmatprep.subr.bf16.mxu0 %v2976_v56  ;;  %2888 = vmatprep.subr.bf16.mxu1 %v3337_v38  ;;  %v3041_v38 = vld [vmem:[#allocation2 + $0x1a0] ss:$16 sps:$4 sm:$0xff]   ;;  %v3073_v56 = vld [vmem:[#allocation2 + $0x104] ss:$16 sps:$4 sm:$0xff]  }
  0x4a   :  { %v3068_v55 = vld [vmem:[#allocation2 + $0x320] ss:$16 sps:$4 sm:$0xff]  }
  0x4c   :  { %828 = vmatpush1.bf16.msra.mxu0 %v2974_v57  ;;  %2889 = vmatpush3.bf16.msra.mxu1 %v2980_v58  ;;  %v3076_v57 = vld [vmem:[#allocation2 + $0x304] ss:$16 sps:$4 sm:$0xff]   ;;  %v3071_v58 = vld [vmem:[#allocation2 + $0x100] ss:$16 sps:$4 sm:$0xff]  }
  0x4d   :  { %1922 = vmatprep.subr.bf16.mxu0 %v2983_v59  ;;  %1965 = vmatprep.subr.bf16.mxu1 %v2986_v60  ;;  %v3074_v59 = vld [vmem:[#allocation2 + $0x300] ss:$16 sps:$4 sm:$0xff]   ;;  %v3079_v60 = vld [vmem:[#allocation2 + $0x4e4] ss:$16 sps:$4 sm:$0xff]  }
  0x4f   :  { %846 = vmatmul.mubr.bf16.vlgmr.msra.gmra.mxu0 %v3486_v34  ;;  %2891 = vmatmul.mubr.bf16.vlgmr.msra.gmra.mxu1 %v3486_v34  ;;  %v3035_v34 = vld [vmem:[#allocation2 + $0x1c0] ss:$16 sps:$4 sm:$0xff]  }
  0x50   :  { %1923 = vmatpush1.bf16.msra.mxu0 %v2981_v61  ;;  %1966 = vmatpush1.bf16.msra.mxu1 %v2984_v62  ;;  %v3082_v61 = vld [vmem:[#allocation2 + $0xec] ss:$16 sps:$4 sm:$0xff]   ;;  %v367_v62 = vlaneseq }
  0x51   :  { %1924 = vmatprep.subr.bf16.mxu0 %v2989_v63  ;;  %1967 = vmatprep.subr.bf16.mxu1 %v2992_v1 }
  0x52   :  { %v3562_v63 = vshrl.u32 %v367_v62, 7  ;;  %v3115_v62 = vld [vmem:[#allocation2 + $0x424] ss:$16 sps:$4 sm:$0xff]  }
  0x54   :  { %1925 = vmatpush1.bf16.msra.mxu0 %v2987_v2  ;;  %1968 = vmatpush1.bf16.msra.mxu1 %v2990_v3  ;;  %v377_v1 = vsub.s32 2, %v3562_v63  ;;  %v381_v2 = vsub.s32 3, %v3562_v63  ;;  %v3569_v3 = vld [vmem:[%s3757_s2] sm:$0x7f] }
  0x55   :  { %1926 = vmatprep.subr.bf16.mxu0 %v2995_v4  ;;  %1969 = vmatprep.subr.bf16.mxu1 %v2998_v5  ;;  %v373_v4 = vsub.s32 1, %v3562_v63  ;;  %v369_v5 = vsub.s32 0, %v3562_v63 }
  0x58   :  { %1927 = vmatpush1.bf16.msra.mxu0 %v2993_v6  ;;  %1970 = vmatpush1.bf16.msra.mxu1 %v2996_v7  ;;  %v378_v6 = vrot.slane %v3569_v3, %v377_v1  ;;  %v382_v7 = vrot.slane %v3569_v3, %v381_v2 }
  0x59   :  { %1928 = vmatprep.subr.bf16.mxu0 %v3001_v8  ;;  %1971 = vmatprep.subr.bf16.mxu1 %v3004_v9 }
  0x5c   :  { %1929 = vmatpush1.bf16.msra.mxu0 %v2999_v10  ;;  %1972 = vmatpush1.bf16.msra.mxu1 %v3002_v11  ;;  %v374_v10 = vrot.slane %v3569_v3, %v373_v4  ;;  %v370_v11 = vrot.slane %v3569_v3, %v369_v5 }
  0x5d   :  { %1930 = vmatprep.subr.bf16.mxu0 %v3007_v12  ;;  %1973 = vmatprep.subr.bf16.mxu1 %v3010_v13 }
  0x60   :  { %1931 = vmatpush1.bf16.msra.mxu0 %v3005_v14  ;;  %1974 = vmatpush1.bf16.msra.mxu1 %v3008_v15 }
  0x61   :  { %1932 = vmatprep.subr.bf16.mxu0 %v3013_v16  ;;  %1975 = vmatprep.subr.bf16.mxu1 %v3016_v17 }
  0x64   :  { %1933 = vmatpush1.bf16.msra.mxu0 %v3011_v18  ;;  %1976 = vmatpush1.bf16.msra.mxu1 %v3014_v19 }
  0x65   :  { %1934 = vmatprep.subr.bf16.mxu0 %v3019_v20  ;;  %1977 = vmatprep.subr.bf16.mxu1 %v3022_v21 }
  0x68   :  { %1935 = vmatpush1.bf16.msra.mxu0 %v3017_v22  ;;  %1978 = vmatpush1.bf16.msra.mxu1 %v3020_v23 }
  0x69   :  { %1936 = vmatprep.subr.bf16.mxu0 %v3025_v24  ;;  %1979 = vmatprep.subr.bf16.mxu1 %v3028_v25 }
  0x6c   :  { %1937 = vmatpush1.bf16.msra.mxu0 %v3023_v26  ;;  %1980 = vmatpush1.bf16.msra.mxu1 %v3026_v27 }
  0x6d   :  { %1938 = vmatprep.subr.bf16.mxu0 %v3031_v28  ;;  %1981 = vmatprep.subr.bf16.mxu1 %v3034_v29 }
  0x70   :  { %1939 = vmatpush2.bf16.msra.mxu0 %v3029_v30  ;;  %1982 = vmatpush2.bf16.msra.mxu1 %v3032_v31 }
  0x71   :  { %1940 = vmatprep.subr.bf16.mxu0 %v3037_v32  ;;  %1983 = vmatprep.subr.bf16.mxu1 %v3040_v33 }
  0x74   :  { %1941 = vmatpush2.bf16.msra.mxu0 %v3035_v34  ;;  %1984 = vmatpush2.bf16.msra.mxu1 %v3038_v35 }
  0x75   :  { %1942 = vmatprep.subr.bf16.mxu0 %v3043_v36  ;;  %1985 = vmatprep.subr.bf16.mxu1 %v3046_v37  ;;  %v3077_v37 = vld [vmem:[#allocation2 + $0x4e0] ss:$16 sps:$4 sm:$0xff]  }
  0x78   :  { %1943 = vmatpush2.bf16.msra.mxu0 %v3041_v38  ;;  %1986 = vmatpush2.bf16.msra.mxu1 %v3044_v39  ;;  %v3080_v38 = vld [vmem:[#allocation2 + $0xe8] ss:$16 sps:$4 sm:$0xff]  }
  0x79   :  { %1944 = vmatprep.subr.bf16.mxu0 %v3049_v40  ;;  %1987 = vmatprep.subr.bf16.mxu1 %v3052_v41  ;;  %v3085_v40 = vld [vmem:[#allocation2 + $0x4c4] ss:$16 sps:$4 sm:$0xff]   ;;  %v3088_v41 = vld [vmem:[#allocation2 + $0xcc] ss:$16 sps:$4 sm:$0xff]  }
  0x7c   :  { %1945 = vmatpush2.bf16.msra.mxu0 %v3047_v42  ;;  %1988 = vmatpush2.bf16.msra.mxu1 %v3050_v43  ;;  %v3083_v42 = vld [vmem:[#allocation2 + $0x4c0] ss:$16 sps:$4 sm:$0xff]   ;;  %v3086_v43 = vld [vmem:[#allocation2 + $0xc8] ss:$16 sps:$4 sm:$0xff]  }
  0x7d   :  { %1946 = vmatprep.subr.bf16.mxu0 %v3055_v44  ;;  %1989 = vmatprep.subr.bf16.mxu1 %v3058_v45  ;;  %v3091_v44 = vld [vmem:[#allocation2 + $0x4a4] ss:$16 sps:$4 sm:$0xff]   ;;  %v3094_v45 = vld [vmem:[#allocation2 + $0xac] ss:$16 sps:$4 sm:$0xff]  }
  0x80   :  { %1947 = vmatpush2.bf16.msra.mxu0 %v3053_v46  ;;  %1990 = vmatpush2.bf16.msra.mxu1 %v3056_v47  ;;  %v3089_v46 = vld [vmem:[#allocation2 + $0x4a0] ss:$16 sps:$4 sm:$0xff]   ;;  %v3092_v47 = vld [vmem:[#allocation2 + $0xa8] ss:$16 sps:$4 sm:$0xff]  }
  0x81   :  { %1948 = vmatprep.subr.bf16.mxu0 %v3061_v48  ;;  %1991 = vmatprep.subr.bf16.mxu1 %v3064_v49  ;;  %v3097_v48 = vld [vmem:[#allocation2 + $0x484] ss:$16 sps:$4 sm:$0xff]   ;;  %v3100_v49 = vld [vmem:[#allocation2 + $0x8c] ss:$16 sps:$4 sm:$0xff]  }
  0x84   :  { %1949 = vmatpush2.bf16.msra.mxu0 %v3059_v50  ;;  %1992 = vmatpush2.bf16.msra.mxu1 %v3062_v51  ;;  %v3095_v50 = vld [vmem:[#allocation2 + $0x480] ss:$16 sps:$4 sm:$0xff]   ;;  %v3098_v51 = vld [vmem:[#allocation2 + $0x88] ss:$16 sps:$4 sm:$0xff]  }
  0x85   :  { %1950 = vmatprep.subr.bf16.mxu0 %v3067_v52  ;;  %1993 = vmatprep.subr.bf16.mxu1 %v3070_v53  ;;  %v3103_v52 = vld [vmem:[#allocation2 + $0x464] ss:$16 sps:$4 sm:$0xff]   ;;  %v3106_v53 = vld [vmem:[#allocation2 + $0x6c] ss:$16 sps:$4 sm:$0xff]  }
  0x88   :  { %1951 = vmatpush2.bf16.msra.mxu0 %v3065_v54  ;;  %1994 = vmatpush2.bf16.msra.mxu1 %v3068_v55  ;;  %v3101_v54 = vld [vmem:[#allocation2 + $0x460] ss:$16 sps:$4 sm:$0xff]   ;;  %v3104_v55 = vld [vmem:[#allocation2 + $0x68] ss:$16 sps:$4 sm:$0xff]  }
  0x89   :  { %1952 = vmatprep.subr.bf16.mxu0 %v3073_v56  ;;  %1995 = vmatprep.subr.bf16.mxu1 %v3076_v57  ;;  %v389_v56 = vsub.s32 5, %v3562_v63  ;;  %v3109_v57 = vld [vmem:[#allocation2 + $0x444] ss:$16 sps:$4 sm:$0xff]  }
  0x8c   :  { %1953 = vmatpush2.bf16.msra.mxu0 %v3071_v58  ;;  %1996 = vmatpush2.bf16.msra.mxu1 %v3074_v59  ;;  %v3112_v58 = vld [vmem:[#allocation2 + $0x4c] ss:$16 sps:$4 sm:$0xff]   ;;  %v3107_v59 = vld [vmem:[#allocation2 + $0x440] ss:$16 sps:$4 sm:$0xff]  }
  0x8d   :  { %2008 = vmatprep.subr.bf16.mxu0 %v3079_v60  ;;  %2094 = vmatprep.subr.bf16.mxu1 %v3082_v61  ;;  %v3110_v60 = vld [vmem:[#allocation2 + $0x48] ss:$16 sps:$4 sm:$0xff]   ;;  %v390_v61 = vrot.slane %v3569_v3, %v389_v56  ;;  %v3166_v56 = vld [vmem:[#allocation2 + $0x12c] ss:$16 sps:$4 sm:$0xff]  }
  0xef   :  { %v761_v8 = vpop.f32.mrf.mxu0  ;;  %v804_v9 = vpop.f32.mrf.mxu1 }
  0xf0   :  { %v805_v12 = vadd.f32 %v804_v9, %v378_v6  ;;  %v762_v21 = vadd.f32 %v761_v8, %v370_v11 }
  0xf1   :  { %v763_v13 = vpop.f32.mrf.mxu0  ;;  %v806_v14 = vpop.f32.mrf.mxu1 }
  0xf2   :  { %v807_v15 = vadd.f32 %v806_v14, %v382_v7  ;;  %v764_v18 = vadd.f32 %v763_v13, %v374_v10  ;;  %v899_v22 = vmax.f32 %v805_v12, 0.0  ;;  %v897_v33 = vmax.f32 %v762_v21, 0.0  ;;  %v3116_v12 = vld [vmem:[#allocation2 + $0x28] ss:$16 sps:$4 sm:$0xff]   ;;  %v3121_v14 = vld [vmem:[#allocation2 + $0x404] ss:$16 sps:$4 sm:$0xff]  }
  0xf3   :  { %v765_v16 = vpop.f32.mrf.mxu0  ;;  %v808_v17 = vpop.f32.mrf.mxu1  ;;  %v3122_v21 = vld [vmem:[#allocation2 + $0x8] ss:$16 sps:$4 sm:$0xff]  }
  0xf4   :  { %v766_v19 = vadd.f32 %v765_v16, %v370_v11  ;;  %v809_v20 = vadd.f32 %v808_v17, %v378_v6  ;;  %v900_v25 = vmax.f32 %v807_v15, 0.0  ;;  %v898_v30 = vmax.f32 %v764_v18, 0.0  ;;  %v3118_v6 = vld [vmem:[#allocation2 + $0x2c] ss:$16 sps:$4 sm:$0xff]   ;;  %v3113_v11 = vld [vmem:[#allocation2 + $0x420] ss:$16 sps:$4 sm:$0xff]  }
  0xf5   :  { %v767_v23 = vpop.f32.mrf.mxu0  ;;  %v810_v24 = vpop.f32.mrf.mxu1  ;;  %v3124_v15 = vld [vmem:[#allocation2 + $0xc] ss:$16 sps:$4 sm:$0xff]  }
  0xf6   :  { %v906_v26 = vmax.f32 %v809_v20, 0.0  ;;  %v768_v27 = vadd.f32 %v767_v23, %v374_v10  ;;  %v811_v28 = vadd.f32 %v810_v24, %v382_v7  ;;  %v904_v29 = vmax.f32 %v766_v19, 0.0  ;;  %v3119_v20 = vld [vmem:[#allocation2 + $0x400] ss:$16 sps:$4 sm:$0xff]   ;;  %v3127_v24 = vld [vmem:[#allocation2 + $0x5e4] ss:$16 sps:$4 sm:$0xff]  }
  0xf8   :  { %v905_v31 = vmax.f32 %v768_v27, 0.0  ;;  %v907_v32 = vmax.f32 %v811_v28, 0.0  ;;  %v3585_v34 = vpack.c.bf16 %v906_v26, %v899_v22  ;;  %v3589_v39 = vpack.c.bf16 %v904_v29, %v897_v33  ;;  %v3125_v27 = vld [vmem:[#allocation2 + $0x5e0] ss:$16 sps:$4 sm:$0xff]   ;;  %v3128_v28 = vld [vmem:[#allocation2 + $0x1e8] ss:$16 sps:$4 sm:$0xff]  }
  0xf9   :  { %v3134_v33 = vld [vmem:[#allocation2 + $0x1c8] ss:$16 sps:$4 sm:$0xff]  }
  0xfa   :  { %v912_v35 = vpack.c.bf16 %v905_v31, %v898_v30  ;;  %v3587_v36 = vpack.c.bf16 %v907_v32, %v900_v25  ;;  %v3130_v25 = vld [vmem:[#allocation2 + $0x1ec] ss:$16 sps:$4 sm:$0xff]   ;;  %v3133_v30 = vld [vmem:[#allocation2 + $0x5c4] ss:$16 sps:$4 sm:$0xff]   ;;  %v3131_v32 = vld [vmem:[#allocation2 + $0x5c0] ss:$16 sps:$4 sm:$0xff]  }
  0xfb   :  { %v3136_v31 = vld [vmem:[#allocation2 + $0x1cc] ss:$16 sps:$4 sm:$0xff]  }
  0xfc   :  { %1954 = vmatprep.mubr.bf16.mxu0 %v912_v35  ;;  %1997 = vmatprep.mubr.bf16.mxu1 %v3587_v36 }
  0xfd   :  { %1955 = vmatmul.mubr.bf16.vlgmr.msra.gmra.mxu0 %v3589_v39  ;;  %1998 = vmatmul.mubr.bf16.vlgmr.msra.gmra.mxu1 %v3585_v34 }
  0xfe   :  { %2009 = vmatpush1.bf16.msra.mxu0 %v3077_v37  ;;  %2095 = vmatpush1.bf16.msra.mxu1 %v3080_v38  ;;  %v3142_v37 = vld [vmem:[#allocation2 + $0x1ac] ss:$16 sps:$4 sm:$0xff]   ;;  %v3137_v38 = vld [vmem:[#allocation2 + $0x5a0] ss:$16 sps:$4 sm:$0xff]  }
  0xff   :  { %2126 = vmatprep.mubr.bf16.mxu1 %v912_v35  ;;  %2010 = vmatprep.subr.bf16.mxu0 %v3085_v40  ;;  %v3139_v35 = vld [vmem:[#allocation2 + $0x5a4] ss:$16 sps:$4 sm:$0xff]   ;;  %v3140_v40 = vld [vmem:[#allocation2 + $0x1a8] ss:$16 sps:$4 sm:$0xff]  }
 0x100   :  { %2096 = vmatprep.subr.bf16.mxu1 %v3088_v41  ;;  %v3145_v41 = vld [vmem:[#allocation2 + $0x584] ss:$16 sps:$4 sm:$0xff]  }
 0x102   :  { %2011 = vmatpush1.bf16.msra.mxu0 %v3083_v42  ;;  %2097 = vmatpush1.bf16.msra.mxu1 %v3086_v43  ;;  %v3148_v42 = vld [vmem:[#allocation2 + $0x18c] ss:$16 sps:$4 sm:$0xff]   ;;  %v3143_v43 = vld [vmem:[#allocation2 + $0x580] ss:$16 sps:$4 sm:$0xff]  }
 0x103   :  { %2012 = vmatprep.subr.bf16.mxu0 %v3091_v44  ;;  %2098 = vmatprep.subr.bf16.mxu1 %v3094_v45  ;;  %v3146_v44 = vld [vmem:[#allocation2 + $0x188] ss:$16 sps:$4 sm:$0xff]   ;;  %v3151_v45 = vld [vmem:[#allocation2 + $0x564] ss:$16 sps:$4 sm:$0xff]  }
 0x106   :  { %2013 = vmatpush1.bf16.msra.mxu0 %v3089_v46  ;;  %2099 = vmatpush1.bf16.msra.mxu1 %v3092_v47  ;;  %v3154_v46 = vld [vmem:[#allocation2 + $0x16c] ss:$16 sps:$4 sm:$0xff]   ;;  %v3149_v47 = vld [vmem:[#allocation2 + $0x560] ss:$16 sps:$4 sm:$0xff]  }
 0x107   :  { %2014 = vmatprep.subr.bf16.mxu0 %v3097_v48  ;;  %2100 = vmatprep.subr.bf16.mxu1 %v3100_v49  ;;  %v3152_v48 = vld [vmem:[#allocation2 + $0x168] ss:$16 sps:$4 sm:$0xff]   ;;  %v385_v49 = vsub.s32 4, %v3562_v63 }
 0x10a   :  { %2015 = vmatpush1.bf16.msra.mxu0 %v3095_v50  ;;  %2101 = vmatpush1.bf16.msra.mxu1 %v3098_v51  ;;  %v3157_v50 = vld [vmem:[#allocation2 + $0x544] ss:$16 sps:$4 sm:$0xff]   ;;  %v3160_v51 = vld [vmem:[#allocation2 + $0x14c] ss:$16 sps:$4 sm:$0xff]  }
 0x10b   :  { %2016 = vmatprep.subr.bf16.mxu0 %v3103_v52  ;;  %2102 = vmatprep.subr.bf16.mxu1 %v3106_v53  ;;  %v3155_v52 = vld [vmem:[#allocation2 + $0x540] ss:$16 sps:$4 sm:$0xff]   ;;  %v3158_v53 = vld [vmem:[#allocation2 + $0x148] ss:$16 sps:$4 sm:$0xff]  }
 0x10e   :  { %2017 = vmatpush1.bf16.msra.mxu0 %v3101_v54  ;;  %2103 = vmatpush1.bf16.msra.mxu1 %v3104_v55  ;;  %v386_v54 = vrot.slane %v3569_v3, %v385_v49  ;;  %v3163_v55 = vld [vmem:[#allocation2 + $0x524] ss:$16 sps:$4 sm:$0xff]   ;;  %v3218_v49 = vld [vmem:[#allocation2 + $0x408] ss:$16 sps:$4 sm:$0xff]  }
 0x10f   :  { %2018 = vmatprep.subr.bf16.mxu0 %v3109_v57  ;;  %2104 = vmatprep.subr.bf16.mxu1 %v3112_v58  ;;  %v3596_v7 = vpop.f32.mrf.mxu0  ;;  %v3598_v8 = vpop.f32.mrf.mxu1  ;;  %v3161_v57 = vld [vmem:[#allocation2 + $0x520] ss:$16 sps:$4 sm:$0xff]   ;;  %v3164_v58 = vld [vmem:[#allocation2 + $0x128] ss:$16 sps:$4 sm:$0xff]  }
 0x111   :  { %v849_v9 = vpop.f32.mrf.mxu0  ;;  %v2892_v10 = vpop.f32.mrf.mxu1 }
 0x112   :  { %2019 = vmatpush1.bf16.msra.mxu0 %v3107_v59  ;;  %2105 = vmatpush1.bf16.msra.mxu1 %v3110_v60  ;;  %v850_v13 = vadd.f32 %v849_v9, %v390_v61  ;;  %v848_v59 = vadd.f32 %v3596_v7, %v386_v54  ;;  %v3167_v9 = vld [vmem:[#allocation2 + $0x500] ss:$16 sps:$4 sm:$0xff]   ;;  %v3170_v10 = vld [vmem:[#allocation2 + $0x108] ss:$16 sps:$4 sm:$0xff]   ;;  %v3178_v7 = vld [vmem:[#allocation2 + $0x4ec] ss:$16 sps:$4 sm:$0xff]  }
 0x113   :  { %2020 = vmatprep.subr.bf16.mxu0 %v3115_v62  ;;  %2106 = vmatprep.subr.bf16.mxu1 %v3118_v6  ;;  %v3600_v16 = vpop.f32.mrf.mxu0  ;;  %v3602_v17 = vpop.f32.mrf.mxu1  ;;  %v3169_v62 = vld [vmem:[#allocation2 + $0x504] ss:$16 sps:$4 sm:$0xff]   ;;  %v3172_v6 = vld [vmem:[#allocation2 + $0x10c] ss:$16 sps:$4 sm:$0xff]  }
 0x114   :  { %v902_v22 = vmax.f32 %v850_v13, 0.0  ;;  %v852_v60 = vadd.f32 %v3600_v16, %v386_v54  ;;  %v3176_v16 = vld [vmem:[#allocation2 + $0x4e8] ss:$16 sps:$4 sm:$0xff]   ;;  %v3229_v54 = vld [vmem:[#allocation2 + $0x20c] ss:$16 sps:$4 sm:$0xff]  }
 0x115   :  { %v853_v18 = vpop.f32.mrf.mxu0  ;;  %v2893_v19 = vpop.f32.mrf.mxu1 }
 0x116   :  { %2021 = vmatpush1.bf16.msra.mxu0 %v3113_v11  ;;  %2107 = vmatpush1.bf16.msra.mxu1 %v3116_v12  ;;  %v854_v23 = vadd.f32 %v853_v18, %v390_v61  ;;  %v393_v61 = vsub.s32 6, %v3562_v63  ;;  %v901_v11 = vmax.f32 %v848_v59, 0.0  ;;  %v908_v12 = vmax.f32 %v852_v60, 0.0  ;;  %v3238_v59 = vld [vmem:[#allocation2 + $0x5ac] ss:$16 sps:$4 sm:$0xff]  }
 0x117   :  { %2022 = vmatprep.subr.bf16.mxu0 %v3121_v14  ;;  %2108 = vmatprep.subr.bf16.mxu1 %v3124_v15  ;;  %v3175_v14 = vld [vmem:[#allocation2 + $0x624] ss:$16 sps:$4 sm:$0xff]   ;;  %v3173_v15 = vld [vmem:[#allocation2 + $0x620] ss:$16 sps:$4 sm:$0xff]   ;;  %v3233_v60 = vld [vmem:[#allocation2 + $0x3e8] ss:$16 sps:$4 sm:$0xff]  }
 0x118   :  { %v909_v26 = vmax.f32 %v854_v23, 0.0  ;;  %v394_v13 = vrot.slane %v3569_v3, %v393_v61  ;;  %v3613_v18 = vpack.c.bf16 %v908_v12, %v901_v11  ;;  %v3179_v3 = vld [vmem:[#allocation2 + $0x600] ss:$16 sps:$4 sm:$0xff]   ;;  %v3182_v23 = vld [vmem:[#allocation2 + $0x4c8] ss:$16 sps:$4 sm:$0xff]  }
 0x119   :  { %v3236_v61 = vld [vmem:[#allocation2 + $0x5a8] ss:$16 sps:$4 sm:$0xff]   ;;  %v3247_v11 = vld [vmem:[#allocation2 + $0x3ac] ss:$16 sps:$4 sm:$0xff]  }
 0x11a   :  { %2023 = vmatpush1.bf16.msra.mxu0 %v3119_v20  ;;  %2109 = vmatpush1.bf16.msra.mxu1 %v3122_v21  ;;  %v3604_v29 = vpack.c.bf16 %v909_v26, %v902_v22  ;;  %v891_v19 = vadd.f32 %v3598_v8, %v394_v13  ;;  %v894_v20 = vadd.f32 %v3602_v17, %v394_v13  ;;  %v3181_v21 = vld [vmem:[#allocation2 + $0x604] ss:$16 sps:$4 sm:$0xff]   ;;  %v3184_v22 = vld [vmem:[#allocation2 + $0x4cc] ss:$16 sps:$4 sm:$0xff]   ;;  %v3185_v17 = vld [vmem:[#allocation2 + $0x2e8] ss:$16 sps:$4 sm:$0xff]  }
 0x11b   :  { %2024 = vmatprep.subr.bf16.mxu0 %v3127_v24  ;;  %2110 = vmatprep.subr.bf16.mxu1 %v3130_v25  ;;  %v3187_v8 = vld [vmem:[#allocation2 + $0x2ec] ss:$16 sps:$4 sm:$0xff]   ;;  %v3245_v13 = vld [vmem:[#allocation2 + $0x3a8] ss:$16 sps:$4 sm:$0xff]  }
 0x11c   :  { %2040 = vmatprep.mubr.bf16.mxu0 %v3604_v29  ;;  %v903_v24 = vmax.f32 %v891_v19, 0.0  ;;  %v910_v25 = vmax.f32 %v894_v20, 0.0  ;;  %v3190_v26 = vld [vmem:[#allocation2 + $0x4ac] ss:$16 sps:$4 sm:$0xff]   ;;  %v3254_v19 = vld [vmem:[#allocation2 + $0x548] ss:$16 sps:$4 sm:$0xff]  }
 0x11d   :  { %v3250_v12 = vld [vmem:[#allocation2 + $0x56c] ss:$16 sps:$4 sm:$0xff]  }
 0x11e   :  { %2025 = vmatpush2.bf16.msra.mxu0 %v3125_v27  ;;  %2111 = vmatpush2.bf16.msra.mxu1 %v3128_v28  ;;  %v3621_v27 = vpack.c.bf16 %v910_v25, %v903_v24  ;;  %v3193_v28 = vld [vmem:[#allocation2 + $0x2cc] ss:$16 sps:$4 sm:$0xff]   ;;  %v3263_v25 = vld [vmem:[#allocation2 + $0x348] ss:$16 sps:$4 sm:$0xff]  }
 0x11f   :  { %2026 = vmatprep.subr.bf16.mxu0 %v3133_v30  ;;  %2112 = vmatprep.subr.bf16.mxu1 %v3136_v31  ;;  %v3196_v30 = vld [vmem:[#allocation2 + $0x48c] ss:$16 sps:$4 sm:$0xff]   ;;  %v3194_v31 = vld [vmem:[#allocation2 + $0x488] ss:$16 sps:$4 sm:$0xff]  }
 0x120   :  { %v3259_v20 = vld [vmem:[#allocation2 + $0x36c] ss:$16 sps:$4 sm:$0xff]  }
 0x121   :  { %v3268_v24 = vld [vmem:[#allocation2 + $0x50c] ss:$16 sps:$4 sm:$0xff]  }
 0x122   :  { %2027 = vmatpush2.bf16.msra.mxu0 %v3131_v32  ;;  %2113 = vmatpush2.bf16.msra.mxu1 %v3134_v33  ;;  %v3199_v32 = vld [vmem:[#allocation2 + $0x2ac] ss:$16 sps:$4 sm:$0xff]  }
 0x123   :  { %2028 = vmatprep.subr.bf16.mxu0 %v3139_v35  ;;  %2114 = vmatprep.subr.bf16.mxu1 %v3142_v37  ;;  %v3202_v33 = vld [vmem:[#allocation2 + $0x46c] ss:$16 sps:$4 sm:$0xff]   ;;  %v3197_v35 = vld [vmem:[#allocation2 + $0x2a8] ss:$16 sps:$4 sm:$0xff]  }
 0x124   :  { %v3200_v37 = vld [vmem:[#allocation2 + $0x468] ss:$16 sps:$4 sm:$0xff]  }
 0x126   :  { %2029 = vmatpush2.bf16.msra.mxu0 %v3137_v38  ;;  %2115 = vmatpush2.bf16.msra.mxu1 %v3140_v40  ;;  %v3205_v38 = vld [vmem:[#allocation2 + $0x28c] ss:$16 sps:$4 sm:$0xff]  }
 0x127   :  { %2030 = vmatprep.subr.bf16.mxu0 %v3145_v41  ;;  %2116 = vmatprep.subr.bf16.mxu1 %v3148_v42  ;;  %v3208_v40 = vld [vmem:[#allocation2 + $0x44c] ss:$16 sps:$4 sm:$0xff]   ;;  %v3203_v41 = vld [vmem:[#allocation2 + $0x288] ss:$16 sps:$4 sm:$0xff]  }
 0x128   :  { %v3211_v42 = vld [vmem:[#allocation2 + $0x26c] ss:$16 sps:$4 sm:$0xff]  }
 0x12a   :  { %2031 = vmatpush2.bf16.msra.mxu0 %v3143_v43  ;;  %2117 = vmatpush2.bf16.msra.mxu1 %v3146_v44  ;;  %v3214_v43 = vld [vmem:[#allocation2 + $0x42c] ss:$16 sps:$4 sm:$0xff]   ;;  %v3209_v44 = vld [vmem:[#allocation2 + $0x268] ss:$16 sps:$4 sm:$0xff]  }
 0x12b   :  { %2032 = vmatprep.subr.bf16.mxu0 %v3151_v45  ;;  %2118 = vmatprep.subr.bf16.mxu1 %v3154_v46  ;;  %v3212_v45 = vld [vmem:[#allocation2 + $0x428] ss:$16 sps:$4 sm:$0xff]   ;;  %v3217_v46 = vld [vmem:[#allocation2 + $0x24c] ss:$16 sps:$4 sm:$0xff]  }
 0x12e   :  { %2033 = vmatpush2.bf16.msra.mxu0 %v3149_v47  ;;  %2119 = vmatpush2.bf16.msra.mxu1 %v3152_v48  ;;  %v3220_v47 = vld [vmem:[#allocation2 + $0x40c] ss:$16 sps:$4 sm:$0xff]   ;;  %v3215_v48 = vld [vmem:[#allocation2 + $0x248] ss:$16 sps:$4 sm:$0xff]  }
 0x12f   :  { %2034 = vmatprep.subr.bf16.mxu0 %v3157_v50  ;;  %2120 = vmatprep.subr.bf16.mxu1 %v3160_v51  ;;  %v3223_v50 = vld [vmem:[#allocation2 + $0x22c] ss:$16 sps:$4 sm:$0xff]  }
 0x130   :  { %v3226_v51 = vld [vmem:[#allocation2 + $0x5ec] ss:$16 sps:$4 sm:$0xff]  }
 0x132   :  { %2035 = vmatpush2.bf16.msra.mxu0 %v3155_v52  ;;  %2121 = vmatpush2.bf16.msra.mxu1 %v3158_v53  ;;  %v3221_v52 = vld [vmem:[#allocation2 + $0x228] ss:$16 sps:$4 sm:$0xff]  }
 0x133   :  { %2036 = vmatprep.subr.bf16.mxu0 %v3163_v55  ;;  %2122 = vmatprep.subr.bf16.mxu1 %v3166_v56  ;;  %v3224_v53 = vld [vmem:[#allocation2 + $0x5e8] ss:$16 sps:$4 sm:$0xff]   ;;  %v3232_v55 = vld [vmem:[#allocation2 + $0x5cc] ss:$16 sps:$4 sm:$0xff]  }
 0x134   :  { %v3227_v56 = vld [vmem:[#allocation2 + $0x208] ss:$16 sps:$4 sm:$0xff]  }
 0x136   :  { %2037 = vmatpush2.bf16.msra.mxu0 %v3161_v57  ;;  %2123 = vmatpush2.bf16.msra.mxu1 %v3164_v58  ;;  %v3230_v57 = vld [vmem:[#allocation2 + $0x5c8] ss:$16 sps:$4 sm:$0xff]   ;;  %v3235_v58 = vld [vmem:[#allocation2 + $0x3ec] ss:$16 sps:$4 sm:$0xff]  }
 0x137   :  { %2038 = vmatprep.subr.bf16.mxu0 %v3169_v62  ;;  %2124 = vmatprep.subr.bf16.mxu1 %v3172_v6  ;;  %v3241_v62 = vld [vmem:[#allocation2 + $0x3cc] ss:$16 sps:$4 sm:$0xff]  }
 0x138   :  { %v3244_v6 = vld [vmem:[#allocation2 + $0x58c] ss:$16 sps:$4 sm:$0xff]  }
 0x13a   :  { %2039 = vmatpush2.bf16.msra.mxu0 %v3167_v9  ;;  %2125 = vmatpush2.bf16.msra.mxu1 %v3170_v10  ;;  %v3239_v9 = vld [vmem:[#allocation2 + $0x3c8] ss:$16 sps:$4 sm:$0xff]  }
 0x13b   :  { %2063 = vmatprep.subr.bf16.mxu0 %v3175_v14  ;;  %2180 = vmatprep.subr.bf16.mxu1 %v3178_v7  ;;  %v3242_v10 = vld [vmem:[#allocation2 + $0x588] ss:$16 sps:$4 sm:$0xff]   ;;  %v3253_v7 = vld [vmem:[#allocation2 + $0x38c] ss:$16 sps:$4 sm:$0xff]  }
 0x13c   :  { %v3248_v14 = vld [vmem:[#allocation2 + $0x568] ss:$16 sps:$4 sm:$0xff]  }
 0x13d   :  { %2041 = vmatmul.mubr.bf16.vlgmr.msra.gmra.mxu0 %v3613_v18  ;;  %2127 = vmatmul.mubr.bf16.vlgmr.msra.gmra.mxu1 %v3589_v39  ;;  %v3188_v39 = vld [vmem:[#allocation2 + $0x4a8] ss:$16 sps:$4 sm:$0xff]  }
 0x13e   :  { %2064 = vmatpush1.bf16.msra.mxu0 %v3173_v15  ;;  %2181 = vmatpush1.bf16.msra.mxu1 %v3176_v16  ;;  %v3256_v15 = vld [vmem:[#allocation2 + $0x54c] ss:$16 sps:$4 sm:$0xff]   ;;  %v3251_v16 = vld [vmem:[#allocation2 + $0x388] ss:$16 sps:$4 sm:$0xff]  }
 0x13f   :  { %2212 = vmatprep.mubr.bf16.mxu1 %v3604_v29  ;;  %2065 = vmatprep.subr.bf16.mxu0 %v3181_v21  ;;  %v3191_v29 = vld [vmem:[#allocation2 + $0x2c8] ss:$16 sps:$4 sm:$0xff]   ;;  %v3262_v21 = vld [vmem:[#allocation2 + $0x52c] ss:$16 sps:$4 sm:$0xff]  }
 0x140   :  { %2182 = vmatprep.subr.bf16.mxu1 %v3184_v22  ;;  %2083 = vmatprep.mubr.bf16.mxu0 %v3336_v0  ;;  %v3257_v22 = vld [vmem:[#allocation2 + $0x368] ss:$16 sps:$4 sm:$0xff]  }
 0x142   :  { %2066 = vmatpush1.bf16.msra.mxu0 %v3179_v3  ;;  %2183 = vmatpush1.bf16.msra.mxu1 %v3182_v23  ;;  %v3260_v3 = vld [vmem:[#allocation2 + $0x528] ss:$16 sps:$4 sm:$0xff]   ;;  %v3265_v23 = vld [vmem:[#allocation2 + $0x34c] ss:$16 sps:$4 sm:$0xff]  }
 0x143   :  { %2137 = vmatprep.subr.bf16.mxu0 %v3187_v8  ;;  %2184 = vmatprep.subr.bf16.mxu1 %v3190_v26  ;;  %v3266_v8 = vld [vmem:[#allocation2 + $0x508] ss:$16 sps:$4 sm:$0xff]   ;;  %v3271_v26 = vld [vmem:[#allocation2 + $0x32c] ss:$16 sps:$4 sm:$0xff]  }
 0x145   :  { %2810 = vmatmul.mubr.msk.bf16.vlgmr.msra.gmra.mxu0 %vm1918_vm1, %v3621_v27 }
 0x146   :  { %2138 = vmatpush1.bf16.msra.mxu0 %v3185_v17  ;;  %2169 = vmatprep.mubr.bf16.mxu0 %v3587_v36  ;;  %v3206_v36 = vld [vmem:[#allocation2 + $0x448] ss:$16 sps:$4 sm:$0xff]  }
 0x147   :  { %2185 = vmatpush1.bf16.msra.mxu1 %v3188_v39  ;;  %2139 = vmatprep.subr.bf16.mxu0 %v3193_v28  ;;  %v3269_v17 = vld [vmem:[#allocation2 + $0x328] ss:$16 sps:$4 sm:$0xff]   ;;  %v3274_v39 = vld [vmem:[#allocation2 + $0x30c] ss:$16 sps:$4 sm:$0xff]  }
 0x148   :  { %2186 = vmatprep.subr.bf16.mxu1 %v3196_v30  ;;  %v3272_v28 = vld [vmem:[#allocation2 + $0x308] ss:$16 sps:$4 sm:$0xff]   ;;  %v3277_v30 = vld [vmem:[#allocation2 + $0x62c] ss:$16 sps:$4 sm:$0xff]  }
 0x14a   :  { %2140 = vmatpush1.bf16.msra.mxu0 %v3191_v29  ;;  %v3275_v29 = vld [vmem:[#allocation2 + $0x628] ss:$16 sps:$4 sm:$0xff]  }
 0x14b   :  { %2187 = vmatpush1.bf16.msra.mxu1 %v3194_v31  ;;  %2141 = vmatprep.subr.bf16.mxu0 %v3199_v32  ;;  %v3280_v31 = vld [vmem:[#allocation2 + $0x60c] ss:$16 sps:$4 sm:$0xff]   ;;  %v3278_v32 = vld [vmem:[#allocation2 + $0x608] ss:$16 sps:$4 sm:$0xff]  }
 0x14c   :  { %2188 = vmatprep.subr.bf16.mxu1 %v3202_v33  ;;  %v3281_v33 = vld [vmem:[%s3760_s5 + $0x78] sm:$0xff]  }
 0x14e   :  { %2142 = vmatpush1.bf16.msra.mxu0 %v3197_v35  ;;  %v3283_v35 = vld [vmem:[%s3760_s5 + $0x70] sm:$0xff]  }
 0x14f   :  { %2189 = vmatpush1.bf16.msra.mxu1 %v3200_v37  ;;  %2143 = vmatprep.subr.bf16.mxu0 %v3205_v38  ;;  %v3285_v37 = vld [vmem:[%s3760_s5 + $0x68] sm:$0xff]  }
 0x150   :  { %2190 = vmatprep.subr.bf16.mxu1 %v3208_v40  ;;  %v3286_v38 = vld [vmem:[%s3760_s5 + $0x28] sm:$0xff]   ;;  %v3297_v40 = vld [vmem:[%s3760_s5 + $0xb8] sm:$0xff]  }
 0x152   :  { %2144 = vmatpush1.bf16.msra.mxu0 %v3203_v41  ;;  %v3298_v41 = vld [vmem:[%s3760_s5 + $0xb0] sm:$0xff]  }
 0x153   :  { %2191 = vmatpush1.bf16.msra.mxu1 %v3206_v36  ;;  %2145 = vmatprep.subr.bf16.mxu0 %v3211_v42  ;;  %v3288_v36 = vld [vmem:[%s3760_s5 + $0x20] sm:$0xff]   ;;  %v3289_v42 = vld [vmem:[%s3760_s5 + $0x58] sm:$0xff]  }
 0x154   :  { %2192 = vmatprep.subr.bf16.mxu1 %v3214_v43  ;;  %v3299_v43 = vld [vmem:[%s3760_s5 + $0xa8] sm:$0xff]  }
 0x156   :  { %2146 = vmatpush1.bf16.msra.mxu0 %v3209_v44  ;;  %v3290_v44 = vld [vmem:[%s3760_s5 + $0x18] sm:$0xff]  }
 0x157   :  { %2193 = vmatpush1.bf16.msra.mxu1 %v3212_v45  ;;  %2147 = vmatprep.subr.bf16.mxu0 %v3217_v46  ;;  %v3291_v45 = vld [vmem:[%s3760_s5 + $0x50] sm:$0xff]   ;;  %v3300_v46 = vld [vmem:[%s3760_s5 + $0xa0] sm:$0xff]  }
 0x158   :  { %2194 = vmatprep.subr.bf16.mxu1 %v3220_v47  ;;  %v3292_v47 = vld [vmem:[%s3760_s5 + $0x10] sm:$0xff]  }
 0x15a   :  { %2148 = vmatpush1.bf16.msra.mxu0 %v3215_v48  ;;  %v3293_v48 = vld [vmem:[%s3760_s5 + $0x48] sm:$0xff]  }
 0x15b   :  { %2195 = vmatpush1.bf16.msra.mxu1 %v3218_v49  ;;  %2149 = vmatprep.subr.bf16.mxu0 %v3223_v50  ;;  %v3301_v49 = vld [vmem:[%s3760_s5 + $0x98] sm:$0xff]   ;;  %v3294_v50 = vld [vmem:[%s3760_s5 + $0x8] sm:$0xff]  }
 0x15c   :  { %2196 = vmatprep.subr.bf16.mxu1 %v3226_v51  ;;  %v3295_v51 = vld [vmem:[%s3760_s5 + $0x40] sm:$0xff]  }
 0x15e   :  { %2150 = vmatpush1.bf16.msra.mxu0 %v3221_v52  ;;  %v3302_v52 = vld [vmem:[%s3760_s5 + $0x90] sm:$0xff]  }
 0x15f   :  { %2197 = vmatpush2.bf16.msra.mxu1 %v3224_v53  ;;  %2151 = vmatprep.subr.bf16.mxu0 %v3229_v54  ;;  %v3296_v53 = vld [vmem:[%s3760_s5] sm:$0xff]   ;;  %v3303_v54 = vld [vmem:[%s3760_s5 + $0x88] sm:$0xff]  }
 0x160   :  { %2198 = vmatprep.subr.bf16.mxu1 %v3232_v55  ;;  %v3304_v55 = vld [vmem:[%s3760_s5 + $0x80] sm:$0xff]  }
 0x162   :  { %2152 = vmatpush1.bf16.msra.mxu0 %v3227_v56  ;;  %v3305_v56 = vld [vmem:[%s3760_s5 + $0xe8] sm:$0xff]  }
 0x163   :  { %2199 = vmatpush2.bf16.msra.mxu1 %v3230_v57  ;;  %2153 = vmatprep.subr.bf16.mxu0 %v3235_v58  ;;  %v3306_v57 = vld [vmem:[%s3760_s5 + $0xe0] sm:$0xff]   ;;  %v3307_v58 = vld [vmem:[%s3760_s5 + $0xd8] sm:$0xff]  }
 0x164   :  { %2200 = vmatprep.subr.bf16.mxu1 %v3238_v59  ;;  %v3308_v59 = vld [vmem:[%s3760_s5 + $0xd0] sm:$0xff]  }
 0x166   :  { %2154 = vmatpush2.bf16.msra.mxu0 %v3233_v60  ;;  %v3309_v60 = vld [vmem:[%s3760_s5 + $0xc8] sm:$0xff]  }
 0x167   :  { %2201 = vmatpush2.bf16.msra.mxu1 %v3236_v61  ;;  %2155 = vmatprep.subr.bf16.mxu0 %v3241_v62  ;;  %v3310_v61 = vld [vmem:[%s3760_s5 + $0xc0] sm:$0xff]  }
 0x168   :  { %2202 = vmatprep.subr.bf16.mxu1 %v3244_v6 }
 0x16a   :  { %2156 = vmatpush2.bf16.msra.mxu0 %v3239_v9 }
 0x16b   :  { %2203 = vmatpush2.bf16.msra.mxu1 %v3242_v10  ;;  %2157 = vmatprep.subr.bf16.mxu0 %v3247_v11 }
 0x16c   :  { %2204 = vmatprep.subr.bf16.mxu1 %v3250_v12  ;;  %v402_v12 = vld [vmem:[%s3759_s4] sm:$0xf] }
 0x16e   :  { %2158 = vmatpush2.bf16.msra.mxu0 %v3245_v13 }
 0x16f   :  { %2205 = vmatpush2.bf16.msra.mxu1 %v3248_v14  ;;  %2159 = vmatprep.subr.bf16.mxu0 %v3253_v7  ;;  %v411_v7 = vrot.slane %v402_v12, %v373_v4 }
 0x170   :  { %2206 = vmatprep.subr.bf16.mxu1 %v3256_v15 }
 0x172   :  { %2160 = vmatpush2.bf16.msra.mxu0 %v3251_v16 }
 0x173   :  { %2207 = vmatpush2.bf16.msra.mxu1 %v3254_v19  ;;  %2161 = vmatprep.subr.bf16.mxu0 %v3259_v20 }
 0x174   :  { %2208 = vmatprep.subr.bf16.mxu1 %v3262_v21 }
 0x176   :  { %2162 = vmatpush2.bf16.msra.mxu0 %v3257_v22 }
 0x177   :  { %2209 = vmatpush2.bf16.msra.mxu1 %v3260_v3  ;;  %2163 = vmatprep.subr.bf16.mxu0 %v3265_v23 }
 0x178   :  { %2210 = vmatprep.subr.bf16.mxu1 %v3268_v24 }
 0x17a   :  { %2164 = vmatpush2.bf16.msra.mxu0 %v3263_v25 }
 0x17b   :  { %2211 = vmatpush2.bf16.msra.mxu1 %v3266_v8  ;;  %2165 = vmatprep.subr.bf16.mxu0 %v3271_v26 }
 0x17c   :  { %2503 = vmatprep.subr.bf16.mxu1 %v3336_v0 }
 0x17e   :  { %2213 = vmatmul.mubr.bf16.vlgmr.msra.gmra.mxu1 %v3613_v18  ;;  %2166 = vmatpush2.bf16.msra.mxu0 %v3269_v17  ;;  %v3282_v18 = vld [vmem:[%s3760_s5 + $0x38] sm:$0xff]  }
 0x17f   :  { %2167 = vmatprep.subr.bf16.mxu0 %v3274_v39  ;;  %2504 = vmatpush1.bf16.msra.mxu1 %v3297_v40 }
 0x180   :  { %2505 = vmatprep.subr.bf16.mxu1 %v3336_v0 }
 0x182   :  { %2168 = vmatpush2.bf16.msra.mxu0 %v3272_v28 }
 0x183   :  { %2235 = vmatprep.subr.bf16.mxu0 %v3277_v30  ;;  %2506 = vmatpush1.bf16.msra.mxu1 %v3298_v41 }
 0x184   :  { %2507 = vmatprep.subr.bf16.mxu1 %v3336_v0 }
 0x185   :  { %2170 = vmatmul.mubr.bf16.vlgmr.msra.gmra.mxu0 %v3585_v34  ;;  %v3284_v34 = vld [vmem:[%s3760_s5 + $0x30] sm:$0xff]  }
 0x186   :  { %2236 = vmatpush1.bf16.msra.mxu0 %v3275_v29  ;;  %2255 = vmatprep.mubr.bf16.mxu0 %v3336_v0 }
 0x187   :  { %2237 = vmatprep.subr.bf16.mxu0 %v3280_v31  ;;  %2508 = vmatpush1.bf16.msra.mxu1 %v3299_v43 }
 0x188   :  { %2509 = vmatprep.subr.bf16.mxu1 %v3336_v0 }
 0x18a   :  { %2238 = vmatpush1.bf16.msra.mxu0 %v3278_v32 }
 0x18b   :  { %2852 = vmatprep.subr.bf16.mxu0 %v3281_v33  ;;  %2510 = vmatpush1.bf16.msra.mxu1 %v3300_v46 }
 0x18c   :  { %2511 = vmatprep.subr.bf16.mxu1 %v3336_v0 }
 0x18d   :  { %2811 = vmatmul.mubr.msk.bf16.vlgmr.msra.gmra.mxu0 %vm1918_vm1, %v3621_v27  ;;  %v3287_v27 = vld [vmem:[%s3760_s5 + $0x60] sm:$0xff]  }
 0x18e   :  { %2853 = vmatpush3.bf16.msra.mxu0 %v3282_v18 }
 0x18f   :  { %2854 = vmatprep.subr.bf16.mxu0 %v3283_v35  ;;  %2512 = vmatpush1.bf16.msra.mxu1 %v3301_v49  ;;  %v415_v49 = vrot.slane %v402_v12, %v377_v1 }
 0x190   :  { %2513 = vmatprep.subr.bf16.mxu1 %v3336_v0 }
 0x192   :  { %2855 = vmatpush3.bf16.msra.mxu0 %v3284_v34 }
 0x193   :  { %2856 = vmatprep.subr.bf16.mxu0 %v3285_v37  ;;  %2514 = vmatpush1.bf16.msra.mxu1 %v3302_v52 }
 0x194   :  { %2515 = vmatprep.subr.bf16.mxu1 %v3336_v0 }
 0x196   :  { %2857 = vmatpush3.bf16.msra.mxu0 %v3286_v38 }
 0x197   :  { %2858 = vmatprep.subr.bf16.mxu0 %v3287_v27  ;;  %2516 = vmatpush1.bf16.msra.mxu1 %v3303_v54 }
 0x198   :  { %2517 = vmatprep.subr.bf16.mxu1 %v3336_v0 }
 0x19a   :  { %2859 = vmatpush3.bf16.msra.mxu0 %v3288_v36 }
 0x19b   :  { %2860 = vmatprep.subr.bf16.mxu0 %v3289_v42  ;;  %2518 = vmatpush1.bf16.msra.mxu1 %v3304_v55 }
 0x19c   :  { %2523 = vmatprep.subr.bf16.mxu1 %v3336_v0 }
 0x19e   :  { %2861 = vmatpush3.bf16.msra.mxu0 %v3290_v44 }
 0x19f   :  { %2862 = vmatprep.subr.bf16.mxu0 %v3291_v45  ;;  %2524 = vmatpush2.bf16.msra.mxu1 %v3305_v56 }
 0x1a0   :  { %2525 = vmatprep.subr.bf16.mxu1 %v3336_v0 }
 0x1a2   :  { %2863 = vmatpush3.bf16.msra.mxu0 %v3292_v47 }
 0x1a3   :  { %2864 = vmatprep.subr.bf16.mxu0 %v3293_v48  ;;  %2526 = vmatpush2.bf16.msra.mxu1 %v3306_v57  ;;  %v419_v48 = vrot.slane %v402_v12, %v381_v2 }
 0x1a4   :  { %2527 = vmatprep.subr.bf16.mxu1 %v3336_v0 }
 0x1a6   :  { %2865 = vmatpush3.bf16.msra.mxu0 %v3294_v50 }
 0x1a7   :  { %2866 = vmatprep.subr.bf16.mxu0 %v3295_v51  ;;  %2528 = vmatpush2.bf16.msra.mxu1 %v3307_v58 }
 0x1a8   :  { %2529 = vmatprep.subr.bf16.mxu1 %v3336_v0 }
 0x1aa   :  { %2867 = vmatpush3.bf16.msra.mxu0 %v3296_v53 }
 0x1ab   :  { %2530 = vmatpush2.bf16.msra.mxu1 %v3308_v59 }
 0x1ac   :  { %2531 = vmatprep.subr.bf16.mxu1 %v3336_v0 }
 0x1af   :  { %2532 = vmatpush2.bf16.msra.mxu1 %v3309_v60 }
 0x1b0   :  { %2533 = vmatprep.subr.bf16.mxu1 %v3336_v0  ;;  %v407_v0 = vrot.slane %v402_v12, %v369_v5 }
 0x1b3   :  { %2534 = vmatpush2.bf16.msra.mxu1 %v3310_v61 }
 0x1bd   :  { %v1956_v62 = vpop.f32.mrf.mxu0  ;;  %v1999_v10 = vpop.f32.mrf.mxu1 }
 0x1be   :  { %v1957_v22 = vadd.f32 %v1956_v62, %v407_v0 }
 0x1bf   :  { %v1958_v6 = vpop.f32.mrf.mxu0  ;;  %v2001_v13 = vpop.f32.mrf.mxu1 }
 0x1c0   :  { %v1959_v20 = vadd.f32 %v1958_v6, %v411_v7  ;;  %v2000_v17 = vadd.f32 %v1999_v10, %v1957_v22 }
 0x1c1   :  { %v1960_v9 = vpop.f32.mrf.mxu0  ;;  %v2003_v16 = vpop.f32.mrf.mxu1 }
 0x1c2   :  { %v1961_v21 = vadd.f32 %v1960_v9, %v407_v0  ;;  %v2002_v8 = vadd.f32 %v2001_v13, %v1959_v20 }
 0x1c3   :  { %v1962_v11 = vpop.f32.mrf.mxu0  ;;  %v2005_v24 = vpop.f32.mrf.mxu1 }
 0x1c4   :  { %v1963_v23 = vadd.f32 %v1962_v11, %v411_v7  ;;  %v2004_v26 = vadd.f32 %v2003_v16, %v1961_v21 }
 0x1c6   :  { %v2006_v28 = vadd.f32 %v2005_v24, %v1963_v23 }
 0x1fd   :  { %v2042_v14 = vpop.f32.mrf.mxu0  ;;  %v2128_v42 = vpop.f32.mrf.mxu1 }
 0x1fe   :  { %v2043_v29 = vadd.f32 %v2042_v14, %v2000_v17  ;;  %v2129_v55 = vadd.f32 %v2128_v42, %v415_v49  ;;  %v2552_v17 = vld [vmem:[%s3761_s6] ss:$0 sm:$0xff] }
 0x1ff   :  { %v2044_v15 = vpop.f32.mrf.mxu0  ;;  %v2130_v43 = vpop.f32.mrf.mxu1 }
 0x200   :  { %v2045_v30 = vadd.f32 %v2044_v15, %v2002_v8  ;;  %v2131_v53 = vadd.f32 %v2130_v43, %v419_v48 }
 0x201   :  { %v2046_v19 = vpop.f32.mrf.mxu0  ;;  %v2132_v44 = vpop.f32.mrf.mxu1 }
 0x202   :  { %v2047_v4 = vadd.f32 %v2046_v19, %v2004_v26  ;;  %v2133_v54 = vadd.f32 %v2132_v44, %v415_v49 }
 0x203   :  { %v2048_v3 = vpop.f32.mrf.mxu0  ;;  %v2134_v45 = vpop.f32.mrf.mxu1 }
 0x204   :  { %v2049_v5 = vadd.f32 %v2048_v3, %v2006_v28  ;;  %v2135_v57 = vadd.f32 %v2134_v45, %v419_v48 }
 0x205   :  { %v2085_v25 = vpop.f32.mrf.mxu0 }
 0x206   :  { %v2086_v18 = vadd.f32 %v2085_v25, %v2043_v29 }
 0x207   :  { %v2087_v39 = vpop.f32.mrf.mxu0 }
 0x208   :  { %v2088_v32 = vadd.f32 %v2087_v39, %v2045_v30  ;;  %v2266_v40 = vmax.f32 %v2086_v18, 0.0 }
 0x209   :  { %v2089_v31 = vpop.f32.mrf.mxu0 }
 0x20a   :  { %v2090_v33 = vadd.f32 %v2089_v31, %v2047_v4  ;;  %v2267_v38 = vmax.f32 %v2088_v32, 0.0 }
 0x20b   :  { %v2091_v35 = vpop.f32.mrf.mxu0 }
 0x20c   :  { %v2092_v34 = vadd.f32 %v2091_v35, %v2049_v5  ;;  %v2270_v37 = vmax.f32 %v2090_v33, 0.0 }
 0x20e   :  { %v2271_v27 = vmax.f32 %v2092_v34, 0.0  ;;  %v2274_v36 = vpack.c.bf16 %v2270_v37, %v2266_v40 }
 0x210   :  { %v2275_v41 = vpack.c.bf16 %v2271_v27, %v2267_v38 }
 0x212   :  { %2494 = vmatprep.mubr.bf16.mxu0 %v2275_v41 }
 0x213   :  { %2495 = vmatmul.mubr.bf16.vlgmr.msra.gmra.mxu0 %v2274_v36 }
 0x23e   :  { %v2214_v46 = vpop.f32.mrf.mxu1 }
 0x240   :  { %v2216_v51 = vpop.f32.mrf.mxu1 }
 0x242   :  { %v2218_v60 = vpop.f32.mrf.mxu1 }
 0x244   :  { %v2220_v11 = vpop.f32.mrf.mxu1 }
 0x245   :  { %v2171_v47 = vpop.f32.mrf.mxu0 }
 0x246   :  { %v2172_v61 = vadd.f32 %v2171_v47, %v2129_v55 }
 0x247   :  { %v2173_v50 = vpop.f32.mrf.mxu0 }
 0x248   :  { %v2174_v58 = vadd.f32 %v2173_v50, %v2131_v53  ;;  %v2215_v63 = vadd.f32 %v2214_v46, %v2172_v61 }
 0x249   :  { %v2175_v52 = vpop.f32.mrf.mxu0 }
 0x24a   :  { %v2176_v59 = vadd.f32 %v2175_v52, %v2133_v54  ;;  %v2217_v10 = vadd.f32 %v2216_v51, %v2174_v58 }
 0x24b   :  { %v2177_v56 = vpop.f32.mrf.mxu0 }
 0x24c   :  { %v2178_v6 = vadd.f32 %v2177_v56, %v2135_v57  ;;  %v2219_v2 = vadd.f32 %v2218_v60, %v2176_v59 }
 0x24d   :  { %v2257_v62 = vpop.f32.mrf.mxu0 }
 0x24e   :  { %v2221_v14 = vadd.f32 %v2220_v11, %v2178_v6  ;;  %v2258_v7 = vadd.f32 %v2257_v62, %v2215_v63 }
 0x24f   :  { %v2259_v9 = vpop.f32.mrf.mxu0 }
 0x250   :  { %v2260_v12 = vadd.f32 %v2259_v9, %v2217_v10  ;;  %v2268_v21 = vmax.f32 %v2258_v7, 0.0 }
 0x251   :  { %v2261_v1 = vpop.f32.mrf.mxu0 }
 0x252   :  { %v2262_v13 = vadd.f32 %v2261_v1, %v2219_v2  ;;  %v2269_v19 = vmax.f32 %v2260_v12, 0.0 }
 0x253   :  { %v2263_v0 = vpop.f32.mrf.mxu0 }
 0x254   :  { %v2264_v15 = vadd.f32 %v2263_v0, %v2221_v14  ;;  %v2272_v16 = vmax.f32 %v2262_v13, 0.0 }
 0x256   :  { %v2273_v20 = vmax.f32 %v2264_v15, 0.0  ;;  %v2276_v3 = vpack.c.bf16 %v2272_v16, %v2268_v21 }
 0x258   :  { %v2277_v22 = vpack.c.bf16 %v2273_v20, %v2269_v19 }
 0x25a   :  { %2842 = vmatprep.mubr.msk.bf16.mxu1 %vm2458_vm2, %v2277_v22 }
 0x25b   :  { %2536 = vmatmul.mubr.bf16.vlgmr.msra.gmra.mxu1 %v2276_v3 }
 0x2d3   :  { %v2868_v23 = vpop.f32.mrf.mxu0 }
 0x2d5   :  { %v2869_v24 = vpop.f32.mrf.mxu0 }
 0x2d6   :  { %v2870_v8 = vadd.f32 %v2869_v24, %v2868_v23 }
 0x2d7   :  { %v2871_v25 = vpop.f32.mrf.mxu0 }
 0x2d8   :  { %v2497_v28 = vadd.f32 %v2870_v8, %v2552_v17 }
 0x2d9   :  { %v2872_v26 = vpop.f32.mrf.mxu0 }
 0x2da   :  { %v2873_v39 = vadd.f32 %v2872_v26, %v2871_v25 }
 0x2dc   :  { %v2500_v31 = vadd.f32 %v2873_v39, %v2552_v17 }
 0x31b   :  { %v2537_v30 = vpop.f32.mrf.mxu1 }
 0x31c   :  { %v2538_v4 = vadd.f32 %v2537_v30, %v2497_v28 }
 0x31d   :  { %v2539_v29 = vpop.f32.mrf.mxu1 }
 0x31e   :  { %2545 = vst.msk [vmem:[%s3762_s7] sm:$0xff] %vm2544_vm3, %v2538_v4 }
 0x31f   :  { %v2540_v5 = vpop.f32.mrf.mxu1 }
 0x320   :  { %v2541_v32 = vadd.f32 %v2540_v5, %v2500_v31 }
 0x321   :  { %v2542_v33 = vpop.f32.mrf.mxu1 }
 0x322   :  { %2546 = vst.msk [vmem:[%s3762_s7 + $0x8] sm:$0xff] %vm2544_vm3, %v2541_v32 }
 0x323   :  { %2551 = vsyncpa [#allocation3], 1 }

</bundles_post_ra>
